<compile_context>
chip_gen: v7x
topology: tpu7x:2x2x1
jax: 0.10.0
libtpu: 0.0.40
codegen_flags: <defaults>
</compile_context>

<pallas_src>
import functools

import jax
import jax.numpy as jnp
from jax.experimental import pallas as pl
from jax.experimental.pallas import tpu as pltpu

LANE = 128


def _round_up(n, m):
    return ((n + m - 1) // m) * m


def _pad2d(a, rows, cols):
    r, c = a.shape
    return jnp.pad(a, ((0, rows - r), (0, cols - c)))


def _choose_seg_tile(n_seg, ppa, target_rows=1024):
    """Segments per grid step: ~target_rows points per step, divides n_seg,
    and keeps the latent block compatible with the (8, 128) tiling rule."""
    s = max(1, min(n_seg, target_rows // max(ppa, 1)))
    for cand in range(s, 0, -1):
        if n_seg % cand == 0 and (cand == n_seg or cand % 8 == 0):
            return cand
    return n_seg


# ----------------------------------------------------------------------------
# Kernel 1: per-anchor PointNet-style encoder.
# One grid step handles `seg_per_step` segments at once: shared point MLP on a
# (seg_per_step * ppa, *) slab, then a per-segment max-pool producing a
# lane-dense (seg_per_step, hidden_pad) latent block.
# ----------------------------------------------------------------------------
def _encoder_kernel(x_ref, w1_ref, b1_ref, w2_ref, b2_ref, w3_ref, b3_ref,
                    lat_ref, *, seg_per_step, ppa):
    x = x_ref[...]                                               # (S*ppa, 3)

    # Layer 1 (K=3): VPU rank-1 updates instead of a nearly-empty MXU matmul.
    h = (x[:, 0:1] * w1_ref[0:1, :]
         + x[:, 1:2] * w1_ref[1:2, :]
         + x[:, 2:3] * w1_ref[2:3, :]
         + b1_ref[...])
    h = jnp.maximum(h, 0.0)

    # Layers 2/3 on the MXU with f32 accumulation.
    h = jnp.dot(h, w2_ref[...], preferred_element_type=jnp.float32) + b2_ref[...]
    h = jnp.maximum(h, 0.0)
    h = jnp.dot(h, w3_ref[...], preferred_element_type=jnp.float32) + b3_ref[...]

    # Symmetric max-pool over each segment's points.
    hp = h.shape[-1]
    lat_ref[...] = jnp.max(h.reshape(seg_per_step, ppa, hp), axis=1)


# ----------------------------------------------------------------------------
# Kernel 2: diffusion q_sample on a lane-dense flattened (rows, 128) view.
# ----------------------------------------------------------------------------
def _qsample_kernel(coef_ref, x_ref, n_ref, o_ref):
    o_ref[...] = coef_ref[0] * x_ref[...] + coef_ref[1] * n_ref[...]


# ----------------------------------------------------------------------------
# Wrapper
# ----------------------------------------------------------------------------
def partglot_finetune_forward(pcds, params, *, num_anchors, num_timesteps, t, noise):
    """pcds: (B, npoints, 3) f32. Returns (latents (B, A, H), x_t (B, npoints, 3))."""
    B, npoints, C = pcds.shape
    assert C == 3
    ppa = npoints // num_anchors                     # points_per_anchor
    n_seg = B * num_anchors
    H1 = params["w1"].shape[1]
    H2 = params["w2"].shape[1]
    H = params["w3"].shape[1]

    # ---------------- encoder ----------------
    seg = _choose_seg_tile(n_seg, ppa)
    assert seg == n_seg or (seg * ppa) % 8 == 0, "segment tile must keep 8-row sublane tiling"

    h1p, h2p, hp = (_round_up(d, LANE) for d in (H1, H2, H))
    w1p = _pad2d(params["w1"].astype(jnp.float32), 3, h1p)
    b1p = _pad2d(params["b1"].astype(jnp.float32), 1, h1p)
    w2p = _pad2d(params["w2"].astype(jnp.float32), h1p, h2p)
    b2p = _pad2d(params["b2"].astype(jnp.float32), 1, h2p)
    w3p = _pad2d(params["w3"].astype(jnp.float32), h2p, hp)
    b3p = _pad2d(params["b3"].astype(jnp.float32), 1, hp)

    x2d = pcds.reshape(n_seg * ppa, C).astype(jnp.float32)

    full = lambda i: (0, 0)
    npts = n_seg * ppa
    enc_cost = pl.CostEstimate(
        flops=2 * npts * (3 * h1p + h1p * h2p + h2p * hp),
        transcendentals=0,
        bytes_accessed=4 * (x2d.size + w1p.size + b1p.size + w2p.size
                            + b2p.size + w3p.size + b3p.size + n_seg * hp),
    )

    lat_pad = pl.pallas_call(
        functools.partial(_encoder_kernel, seg_per_step=seg, ppa=ppa),
        grid=(n_seg // seg,),
        in_specs=[
            pl.BlockSpec((seg * ppa, C), lambda i: (i, 0)),      # points slab
            pl.BlockSpec(w1p.shape, full),
            pl.BlockSpec(b1p.shape, full),
            pl.BlockSpec(w2p.shape, full),
            pl.BlockSpec(b2p.shape, full),
            pl.BlockSpec(w3p.shape, full),
            pl.BlockSpec(b3p.shape, full),
        ],
        out_specs=pl.BlockSpec((seg, hp), lambda i: (i, 0)),     # lane-dense latents
        out_shape=jax.ShapeDtypeStruct((n_seg, hp), jnp.float32),
        compiler_params=pltpu.CompilerParams(
            dimension_semantics=("parallel",),                   # v7x: 2 TCs
            vmem_limit_bytes=32 * 1024 * 1024,                   # safe on v5e/v6e/v7x
        ),
        cost_estimate=enc_cost,
    )(x2d, w1p, b1p, w2p, b2p, w3p, b3p)

    latents = lat_pad[:, :H].reshape(B, num_anchors, H)

    # ---------------- diffusion q_sample (lane-dense flat view) ----------------
    betas = jnp.linspace(1e-4, 0.02, num_timesteps, dtype=jnp.float32)
    alpha_bar = jnp.cumprod(1.0 - betas)
    coefs = jnp.stack(
        [jnp.sqrt(alpha_bar[t]), jnp.sqrt(1.0 - alpha_bar[t])]
    ).astype(jnp.float32)

    total = B * npoints * C
    r0 = pl.cdiv(total, LANE)
    tr = min(512, _round_up(r0, 8))
    rows = _round_up(r0, tr)
    pad = rows * LANE - total

    x_flat = jnp.pad(pcds.reshape(-1).astype(jnp.float32), (0, pad)).reshape(rows, LANE)
    n_flat = jnp.pad(noise.reshape(-1).astype(jnp.float32), (0, pad)).reshape(rows, LANE)

    qs_cost = pl.CostEstimate(
        flops=3 * rows * LANE,
        transcendentals=0,
        bytes_accessed=4 * (3 * rows * LANE + 2),
    )

    xt_flat = pl.pallas_call(
        _qsample_kernel,
        grid=(rows // tr,),
        in_specs=[
            pl.BlockSpec(memory_space=pltpu.MemorySpace.SMEM),   # coefs
            pl.BlockSpec((tr, LANE), lambda i: (i, 0)),
            pl.BlockSpec((tr, LANE), lambda i: (i, 0)),
        ],
        out_specs=pl.BlockSpec((tr, LANE), lambda i: (i, 0)),
        out_shape=jax.ShapeDtypeStruct((rows, LANE), jnp.float32),
        compiler_params=pltpu.CompilerParams(
            dimension_semantics=("parallel",),
            vmem_limit_bytes=32 * 1024 * 1024,
        ),
        cost_estimate=qs_cost,
    )(coefs, x_flat, n_flat)

    x_t = xt_flat.reshape(-1)[:total].reshape(B, npoints, C)
    return latents, x_t


# ----------------------------------------------------------------------------
# Pure-JAX reference for correctness checking.
# ----------------------------------------------------------------------------
def _reference(pcds, params, *, num_anchors, num_timesteps, t, noise):
    B, npoints, C = pcds.shape
    ppa = npoints // num_anchors
    x = pcds.reshape(B * num_anchors, ppa, C).astype(jnp.float32)

    h = jnp.maximum(x @ params["w1"] + params["b1"][0], 0.0)
    h = jnp.maximum(h @ params["w2"] + params["b2"][0], 0.0)
    h = h @ params["w3"] + params["b3"][0]
    lat = jnp.max(h, axis=1).reshape(B, num_anchors, -1)

    betas = jnp.linspace(1e-4, 0.02, num_timesteps, dtype=jnp.float32)
    alpha_bar = jnp.cumprod(1.0 - betas)
    x_t = jnp.sqrt(alpha_bar[t]) * pcds + jnp.sqrt(1.0 - alpha_bar[t]) * noise
    return lat, x_t.astype(jnp.float32)


def _init_params(key, hidden=32, h1=64, h2=128):
    ks = jax.random.split(key, 6)
    scale = 0.1
    return {
        "w1": scale * jax.random.normal(ks[0], (3, h1), jnp.float32),
        "b1": scale * jax.random.normal(ks[1], (1, h1), jnp.float32),
        "w2": scale * jax.random.normal(ks[2], (h1, h2), jnp.float32),
        "b2": scale * jax.random.normal(ks[3], (1, h2), jnp.float32),
        "w3": scale * jax.random.normal(ks[4], (h2, hidden), jnp.float32),
        "b3": scale * jax.random.normal(ks[5], (1, hidden), jnp.float32),
    }


if __name__ == "__main__":
    key = jax.random.PRNGKey(0)
    k_pc, k_noise, k_par = jax.random.split(key, 3)

    # Small shapes consistent with the module's constructor.
    B, npoints, num_anchors, num_timesteps, hidden = 2, 128, 4, 8, 32
    t = 4

    pcds = jax.random.normal(k_pc, (B, npoints, 3), jnp.float32)
    noise = jax.random.normal(k_noise, (B, npoints, 3), jnp.float32)
    params = _init_params(k_par, hidden=hidden)

    # TODO(synk): original forward body is `pass` and the sampler/diffusion
    # reverse-process configs are not given, so only the implied encoder +
    # q_sample hot path is implemented here.
    lat, x_t = partglot_finetune_forward(
        pcds, params,
        num_anchors=num_anchors, num_timesteps=num_timesteps, t=t, noise=noise,
    )
    jax.block_until_ready((lat, x_t))

    lat_ref, x_t_ref = _reference(
        pcds, params,
        num_anchors=num_anchors, num_timesteps=num_timesteps, t=t, noise=noise,
    )
    assert jnp.allclose(lat, lat_ref, atol=1e-5, rtol=1e-5)
    assert jnp.allclose(x_t, x_t_ref, atol=1e-5, rtol=1e-5)

    print("KERNEL_OK")
</pallas_src>

<mosaic_0001>
module attributes {stable_mosaic.version = 11 : i64} {
  func.func @_encoder_kernel(%arg0: i32, %arg1: memref<256x3xf32, #tpu.memory_space<vmem>>, %arg2: memref<3x128xf32, #tpu.memory_space<vmem>>, %arg3: memref<1x128xf32, #tpu.memory_space<vmem>>, %arg4: memref<128x128xf32, #tpu.memory_space<vmem>>, %arg5: memref<1x128xf32, #tpu.memory_space<vmem>>, %arg6: memref<128x128xf32, #tpu.memory_space<vmem>>, %arg7: memref<1x128xf32, #tpu.memory_space<vmem>>, %arg8: memref<8x128xf32, #tpu.memory_space<vmem>>) attributes {dimension_semantics = [#tpu.dimension_semantics<parallel>], iteration_bounds = array<i64: 1>, scalar_prefetch = 0 : i64, scratch_operands = 0 : i64, tpu.core_type = #tpu.core_type<tc>, window_params = [{transform_indices = @transform_0, window_bounds = array<i64: 256, 3>}, {pipeline_mode = #tpu.pipeline_mode<synchronous>, transform_indices = @transform_1, window_bounds = array<i64: 3, 128>}, {pipeline_mode = #tpu.pipeline_mode<synchronous>, transform_indices = @transform_2, window_bounds = array<i64: 1, 128>}, {pipeline_mode = #tpu.pipeline_mode<synchronous>, transform_indices = @transform_3, window_bounds = array<i64: 128, 128>}, {pipeline_mode = #tpu.pipeline_mode<synchronous>, transform_indices = @transform_4, window_bounds = array<i64: 1, 128>}, {pipeline_mode = #tpu.pipeline_mode<synchronous>, transform_indices = @transform_5, window_bounds = array<i64: 128, 128>}, {pipeline_mode = #tpu.pipeline_mode<synchronous>, transform_indices = @transform_6, window_bounds = array<i64: 1, 128>}, {transform_indices = @transform_7, window_bounds = array<i64: 8, 128>}]} {
    %c0 = arith.constant 0 : index
    %c0_0 = arith.constant 0 : index
    %0 = vector.load %arg1[%c0, %c0_0] : memref<256x3xf32, #tpu.memory_space<vmem>>, vector<256x3xf32>
    %1 = vector.extract_strided_slice %0 {offsets = [0, 0], sizes = [256, 1], strides = [1, 1]} : vector<256x3xf32> to vector<256x1xf32>
    %c0_1 = arith.constant 0 : index
    %c0_2 = arith.constant 0 : index
    %2 = vector.load %arg2[%c0_1, %c0_2] : memref<3x128xf32, #tpu.memory_space<vmem>>, vector<1x128xf32>
    %3 = vector.broadcast %1 : vector<256x1xf32> to vector<256x128xf32>
    %4 = vector.broadcast %2 : vector<1x128xf32> to vector<256x128xf32>
    %5 = arith.mulf %3, %4 : vector<256x128xf32>
    %6 = vector.extract_strided_slice %0 {offsets = [0, 1], sizes = [256, 1], strides = [1, 1]} : vector<256x3xf32> to vector<256x1xf32>
    %c1 = arith.constant 1 : index
    %c0_3 = arith.constant 0 : index
    %7 = vector.load %arg2[%c1, %c0_3] : memref<3x128xf32, #tpu.memory_space<vmem>>, vector<1x128xf32>
    %8 = vector.broadcast %6 : vector<256x1xf32> to vector<256x128xf32>
    %9 = vector.broadcast %7 : vector<1x128xf32> to vector<256x128xf32>
    %10 = arith.mulf %8, %9 : vector<256x128xf32>
    %11 = arith.addf %5, %10 : vector<256x128xf32>
    %12 = vector.extract_strided_slice %0 {offsets = [0, 2], sizes = [256, 1], strides = [1, 1]} : vector<256x3xf32> to vector<256x1xf32>
    %c2 = arith.constant 2 : index
    %c0_4 = arith.constant 0 : index
    %13 = vector.load %arg2[%c2, %c0_4] : memref<3x128xf32, #tpu.memory_space<vmem>>, vector<1x128xf32>
    %14 = vector.broadcast %12 : vector<256x1xf32> to vector<256x128xf32>
    %15 = vector.broadcast %13 : vector<1x128xf32> to vector<256x128xf32>
    %16 = arith.mulf %14, %15 : vector<256x128xf32>
    %17 = arith.addf %11, %16 : vector<256x128xf32>
    %c0_5 = arith.constant 0 : index
    %c0_6 = arith.constant 0 : index
    %18 = vector.load %arg3[%c0_5, %c0_6] : memref<1x128xf32, #tpu.memory_space<vmem>>, vector<1x128xf32>
    %19 = vector.broadcast %18 : vector<1x128xf32> to vector<256x128xf32>
    %20 = arith.addf %17, %19 : vector<256x128xf32>
    %cst = arith.constant 0.000000e+00 : f32
    %21 = vector.broadcast %cst : f32 to vector<256x128xf32>
    %22 = arith.maximumf %20, %21 : vector<256x128xf32>
    %c0_7 = arith.constant 0 : index
    %c0_8 = arith.constant 0 : index
    %23 = vector.load %arg4[%c0_7, %c0_8] : memref<128x128xf32, #tpu.memory_space<vmem>>, vector<128x128xf32>
    %cst_9 = arith.constant dense<0.000000e+00> : vector<256x128xf32>
    %24 = tpu.matmul %22, %23, %cst_9 {dimension_numbers = #tpu.dot_dimension_numbers<[1], [0], [0], [1], [0, 0, 1, 1], [], []>} : vector<256x128xf32>, vector<128x128xf32>, vector<256x128xf32> -> vector<256x128xf32>
    %c0_10 = arith.constant 0 : index
    %c0_11 = arith.constant 0 : index
    %25 = vector.load %arg5[%c0_10, %c0_11] : memref<1x128xf32, #tpu.memory_space<vmem>>, vector<1x128xf32>
    %26 = vector.broadcast %25 : vector<1x128xf32> to vector<256x128xf32>
    %27 = arith.addf %24, %26 : vector<256x128xf32>
    %cst_12 = arith.constant 0.000000e+00 : f32
    %28 = vector.broadcast %cst_12 : f32 to vector<256x128xf32>
    %29 = arith.maximumf %27, %28 : vector<256x128xf32>
    %c0_13 = arith.constant 0 : index
    %c0_14 = arith.constant 0 : index
    %30 = vector.load %arg6[%c0_13, %c0_14] : memref<128x128xf32, #tpu.memory_space<vmem>>, vector<128x128xf32>
    %cst_15 = arith.constant dense<0.000000e+00> : vector<256x128xf32>
    %31 = tpu.matmul %29, %30, %cst_15 {dimension_numbers = #tpu.dot_dimension_numbers<[1], [0], [0], [1], [0, 0, 1, 1], [], []>} : vector<256x128xf32>, vector<128x128xf32>, vector<256x128xf32> -> vector<256x128xf32>
    %c0_16 = arith.constant 0 : index
    %c0_17 = arith.constant 0 : index
    %32 = vector.load %arg7[%c0_16, %c0_17] : memref<1x128xf32, #tpu.memory_space<vmem>>, vector<1x128xf32>
    %33 = vector.broadcast %32 : vector<1x128xf32> to vector<256x128xf32>
    %34 = arith.addf %31, %33 : vector<256x128xf32>
    %35 = vector.shape_cast %34 : vector<256x128xf32> to vector<8x32x128xf32>
    %cst_18 = arith.constant dense<0xFF800000> : vector<8x128xf32>
    %36 = vector.multi_reduction <maximumf>, %35, %cst_18 [1] : vector<8x32x128xf32> to vector<8x128xf32>
    %c0_19 = arith.constant 0 : index
    %c0_20 = arith.constant 0 : index
    %37 = vector.load %arg8[%c0_19, %c0_20] : memref<8x128xf32, #tpu.memory_space<vmem>>, vector<8x128xf32>
    tpu.vector_store %arg8[%c0_19, %c0_20], %36 {strides = array<i32>} : memref<8x128xf32, #tpu.memory_space<vmem>>, vector<8x128xf32>,
    return
  }
  func.func @transform_0(%arg0: i32) -> (i32, i32) {
    %c0_i32 = arith.constant 0 : i32
    %c0_i32_0 = arith.constant 0 : i32
    return %arg0, %c0_i32 : i32, i32
  }
  func.func @transform_1(%arg0: i32) -> (i32, i32) {
    %c0_i32 = arith.constant 0 : i32
    %c0_i32_0 = arith.constant 0 : i32
    %c0_i32_1 = arith.constant 0 : i32
    return %c0_i32, %c0_i32_0 : i32, i32
  }
  func.func @transform_2(%arg0: i32) -> (i32, i32) {
    %c0_i32 = arith.constant 0 : i32
    %c0_i32_0 = arith.constant 0 : i32
    %c0_i32_1 = arith.constant 0 : i32
    return %c0_i32, %c0_i32_0 : i32, i32
  }
  func.func @transform_3(%arg0: i32) -> (i32, i32) {
    %c0_i32 = arith.constant 0 : i32
    %c0_i32_0 = arith.constant 0 : i32
    %c0_i32_1 = arith.constant 0 : i32
    return %c0_i32, %c0_i32_0 : i32, i32
  }
  func.func @transform_4(%arg0: i32) -> (i32, i32) {
    %c0_i32 = arith.constant 0 : i32
    %c0_i32_0 = arith.constant 0 : i32
    %c0_i32_1 = arith.constant 0 : i32
    return %c0_i32, %c0_i32_0 : i32, i32
  }
  func.func @transform_5(%arg0: i32) -> (i32, i32) {
    %c0_i32 = arith.constant 0 : i32
    %c0_i32_0 = arith.constant 0 : i32
    %c0_i32_1 = arith.constant 0 : i32
    return %c0_i32, %c0_i32_0 : i32, i32
  }
  func.func @transform_6(%arg0: i32) -> (i32, i32) {
    %c0_i32 = arith.constant 0 : i32
    %c0_i32_0 = arith.constant 0 : i32
    %c0_i32_1 = arith.constant 0 : i32
    return %c0_i32, %c0_i32_0 : i32, i32
  }
  func.func @transform_7(%arg0: i32) -> (i32, i32) {
    %c0_i32 = arith.constant 0 : i32
    %c0_i32_0 = arith.constant 0 : i32
    return %arg0, %c0_i32 : i32, i32
  }
}

</mosaic_0001>

<bundles_post_ra>
// kernel: tpu_custom_call.1
= control target key start
LH: loop header
LB: loop body
LE: loop exit
PB: predicated region body
PF: predicated region fallthrough
CT: control target
= control target key end

     0   :  { %v1764_v2 = vmov 1   ;;  %v1765_v3 = vmov 0   ;;  %s2416_s0 = inlined_call_operand.vmem [shape: f32[256,3], index: 0, kind: input, shape index: {}]   ;;  %s2417_s1 = inlined_call_operand.vmem [shape: f32[3,128], index: 1, kind: input, shape index: {}]   ;;  %s2418_s2 = inlined_call_operand.vmem [shape: f32[1,128], index: 2, kind: input, shape index: {}]   ;;  %s2419_s3 = inlined_call_operand.vmem [shape: f32[128,128], index: 3, kind: input, shape index: {}]   ;;  %s2420_s4 = inlined_call_operand.vmem [shape: f32[1,128], index: 4, kind: input, shape index: {}]   ;;  %s2421_s5 = inlined_call_operand.vmem [shape: f32[128,128], index: 5, kind: input, shape index: {}]   ;;  %s2422_s6 = inlined_call_operand.vmem [shape: f32[1,128], index: 6, kind: input, shape index: {}]   ;;  %s2423_s7 = inlined_call_operand.hbm [shape: f32[8,128], index: 7, kind: output, shape index: {}]  }
   0x1   :  { %v1811_v0 = vld [vmem:[%s2416_s0 + $0x8] sm:$0xff]  ;;  %v27_v1 = vld [vmem:[%s2416_s0] sm:$0xff]  ;;  %1689 = vset.pattern.permute.xlu0 %v1764_v2  ;;  %1691 = vset.pattern.permute.xlu1 %v1765_v3  ;;  %v1825_v4 = vld [vmem:[%s2416_s0 + $0x18] sm:$0xff] }
   0x2   :  { %67 = vperm.xlu1 %1691, %v1811_v0   ;;  %258 = vperm.xlu0 %1689, %v27_v1  }
   0x6   :  { %1692 = vset.pattern.permute.xlu1 %v1764_v2  ;;  %1690 = vset.pattern.permute.xlu0 %v1765_v3 }
   0x7   :  { %262 = vperm.xlu1 %1692, %v1811_v0   ;;  %62 = vperm.xlu0 %1690, %v27_v1  }
   0x8   :  { %12 = vsyncpa [#allocation3], 0  ;;  %v1766_v5 = vmov 2   ;;  %v1832_v6 = vld [vmem:[%s2416_s0 + $0x28] sm:$0xff]  ;;  %v29_v7 = vld [vmem:[%s2416_s0 + $0x10] sm:$0xff]  ;;  %vm1329_vm0 = vcmask 1041409  }
   0x9   :  { %v1842_v8 = vld [vmem:[%s2416_s0 + $0x38] sm:$0xff]  ;;  %v1848_v9 = vld [vmem:[%s2416_s0 + $0x48] sm:$0xff]  ;;  %v31_v13 = vld [vmem:[%s2416_s0 + $0x20] sm:$0xff]  ;;  %vm1331_vm1 = vcmask 1042434   ;;  %vm1333_vm2 = vcmask 1043459   ;;  %vm1335_vm3 = vcmask 1044484  }
   0xa   :  { %v1855_v10 = vld [vmem:[%s2416_s0 + $0x58] sm:$0xff]  ;;  %v1862_v11 = vld [vmem:[%s2416_s0 + $0x68] sm:$0xff]  ;;  %v721_v17 = vld [vmem:[%s2419_s3] sm:$0xff]  ;;  %vm1337_vm4 = vcmask 1045509   ;;  %vm1339_vm5 = vcmask 1046534   ;;  %vm1341_vm6 = vcmask 1047559  }
   0xb   :  { %1693 = vset.pattern.permute.xlu1 %v1766_v5  ;;  %77 = vperm.xlu0 %1690, %v1825_v4   ;;  %v1869_v12 = vld [vmem:[%s2416_s0 + $0x78] sm:$0xff]  ;;  %v1879_v14 = vld [vmem:[%s2416_s0 + $0x88] sm:$0xff]  ;;  %v723_v21 = vld [vmem:[%s2419_s3 + $0x10] sm:$0xff] }
   0xc   :  { %455 = vperm.xlu1 %1693, %v27_v1   ;;  %v1886_v15 = vld [vmem:[%s2416_s0 + $0x98] sm:$0xff]  ;;  %v1892_v16 = vld [vmem:[%s2416_s0 + $0xa8] sm:$0xff]  ;;  %v33_v24 = vld [vmem:[%s2416_s0 + $0x30] sm:$0xff] }
   0xd   :  { %v722_v18 = vld [vmem:[%s2419_s3 + $0x8] sm:$0xff]  ;;  %v1905_v20 = vld [vmem:[%s2416_s0 + $0xb8] sm:$0xff]  ;;  %v725_v26 = vld [vmem:[%s2419_s3 + $0x20] sm:$0xff] }
   0xe   :  { %v1621_v19 = vpack.c.bf16 %v722_v18, %v721_v17  ;;  %v724_v22 = vld [vmem:[%s2419_s3 + $0x18] sm:$0xff]  ;;  %v1921_v25 = vld [vmem:[%s2416_s0 + $0xc8] sm:$0xff]  ;;  %v727_v30 = vld [vmem:[%s2419_s3 + $0x30] sm:$0xff] }
   0xf   :  { %87 = vperm.xlu0 %1690, %v1832_v6   ;;  %v1625_v23 = vpack.c.bf16 %v724_v22, %v723_v21  ;;  %v726_v27 = vld [vmem:[%s2419_s3 + $0x28] sm:$0xff]  ;;  %v1934_v29 = vld [vmem:[%s2416_s0 + $0xd8] sm:$0xff]  ;;  %v729_v34 = vld [vmem:[%s2419_s3 + $0x40] sm:$0xff] }
  0x10   :  { %1694 = vset.pattern.permute.xlu1 %v1765_v3  ;;  %1622 = vmatprep.subr.bf16.mxu0 %v1621_v19  ;;  %v1629_v28 = vpack.c.bf16 %v726_v27, %v725_v26  ;;  %v728_v31 = vld [vmem:[%s2419_s3 + $0x38] sm:$0xff]  ;;  %v1947_v33 = vld [vmem:[%s2416_s0 + $0xe8] sm:$0xff]  ;;  %v731_v38 = vld [vmem:[%s2419_s3 + $0x50] sm:$0xff] }
  0x11   :  { %72 = vperm.xlu1 %1694, %v29_v7   ;;  %1624 = vmatpush3.bf16.msra.mxu0 %v1621_v19  ;;  %v1633_v32 = vpack.c.bf16 %v728_v31, %v727_v30  ;;  %v730_v35 = vld [vmem:[%s2419_s3 + $0x48] sm:$0xff]  ;;  %v1960_v37 = vld [vmem:[%s2416_s0 + $0xf8] sm:$0xff]  ;;  %v733_v41 = vld [vmem:[%s2419_s3 + $0x60] sm:$0xff] }
  0x12   :  { %1626 = vmatprep.subr.bf16.mxu0 %v1625_v23  ;;  %v1637_v36 = vpack.c.bf16 %v730_v35, %v729_v34  ;;  %v732_v39 = vld [vmem:[%s2419_s3 + $0x58] sm:$0xff]  ;;  %v734_v42 = vld [vmem:[%s2419_s3 + $0x68] sm:$0xff]  ;;  %v35_v44 = vld [vmem:[%s2416_s0 + $0x40] sm:$0xff] }
  0x13   :  { %97 = vperm.xlu0 %1690, %v1842_v8   ;;  %v1641_v40 = vpack.c.bf16 %v732_v39, %v731_v38  ;;  %v1645_v43 = vpack.c.bf16 %v734_v42, %v733_v41  ;;  %v735_v45 = vld [vmem:[%s2419_s3 + $0x70] sm:$0xff]  ;;  %v736_v46 = vld [vmem:[%s2419_s3 + $0x78] sm:$0xff]  ;;  %v39_v49 = vld [vmem:[%s2416_s0 + $0x60] sm:$0xff] }
  0x14   :  { %v1649_v47 = vpack.c.bf16 %v736_v46, %v735_v45  ;;  %v37_v48 = vld [vmem:[%s2416_s0 + $0x50] sm:$0xff]  ;;  %v2029_v53 = vld [vmem:[%s2417_s1 + $0x1] ss:$0 sm:$0xff]  ;;  %v2034_v54 = vld [vmem:[%s2417_s1] ss:$0 sm:$0xff] }
  0x15   :  { %1695 = vset.pattern.permute.xlu1 %v1764_v2  ;;  %1628 = vmatpush3.bf16.msra.mxu0 %v1625_v23  ;;  %v41_v50 = vld [vmem:[%s2416_s0 + $0x70] sm:$0xff]  ;;  %v2044_v59 = vld [vmem:[%s2417_s1 + $0x2] ss:$0 sm:$0xff] }
  0x16   :  { %266 = vperm.xlu1 %1695, %v29_v7   ;;  %1630 = vmatprep.subr.bf16.mxu0 %v1629_v28  ;;  %v47_v35 = vld [vmem:[%s2416_s0 + $0xa0] sm:$0xff] }
  0x17   :  { %107 = vperm.xlu0 %1690, %v1848_v9  }
  0x19   :  { %1632 = vmatpush3.bf16.msra.mxu0 %v1629_v28 }
  0x1a   :  { %270 = vperm.xlu1 %1695, %v1825_v4   ;;  %1634 = vmatprep.subr.bf16.mxu0 %v1633_v32 }
  0x1b   :  { %117 = vperm.xlu0 %1690, %v1855_v10  }
  0x1d   :  { %1636 = vmatpush3.bf16.msra.mxu0 %v1633_v32 }
  0x1e   :  { %1696 = vset.pattern.permute.xlu1 %v1766_v5  ;;  %1638 = vmatprep.subr.bf16.mxu0 %v1637_v36 }
  0x1f   :  { %463 = vperm.xlu1 %1696, %v29_v7   ;;  %127 = vperm.xlu0 %1690, %v1862_v11  }
  0x21   :  { %1640 = vmatpush3.bf16.msra.mxu0 %v1637_v36 }
  0x22   :  { %1642 = vmatprep.subr.bf16.mxu0 %v1641_v40 }
  0x23   :  { %1697 = vset.pattern.permute.xlu1 %v1765_v3  ;;  %137 = vperm.xlu0 %1690, %v1869_v12  }
  0x24   :  { %82 = vperm.xlu1 %1697, %v31_v13  }
  0x25   :  { %1644 = vmatpush3.bf16.msra.mxu0 %v1641_v40 }
  0x26   :  { %1646 = vmatprep.subr.bf16.mxu0 %v1645_v43 }
  0x27   :  { %147 = vperm.xlu0 %1690, %v1879_v14  }
  0x28   :  { %1698 = vset.pattern.permute.xlu1 %v1764_v2 }
  0x29   :  { %274 = vperm.xlu1 %1698, %v31_v13   ;;  %1648 = vmatpush3.bf16.msra.mxu0 %v1645_v43 }
  0x2a   :  { %1650 = vmatprep.subr.bf16.mxu0 %v1649_v47 }
  0x2b   :  { %157 = vperm.xlu0 %1690, %v1886_v15  }
  0x2d   :  { %278 = vperm.xlu1 %1698, %v1832_v6   ;;  %1652 = vmatpush3.bf16.msra.mxu0 %v1649_v47 }
  0x2f   :  { %167 = vperm.xlu0 %1690, %v1892_v16  }
  0x31   :  { %1699 = vset.pattern.permute.xlu1 %v1766_v5 }
  0x32   :  { %471 = vperm.xlu1 %1699, %v31_v13  }
  0x33   :  { %177 = vperm.xlu0 %1690, %v1905_v20  }
  0x36   :  { %1700 = vset.pattern.permute.xlu1 %v1765_v3 }
  0x37   :  { %92 = vperm.xlu1 %1700, %v33_v24   ;;  %187 = vperm.xlu0 %1690, %v1921_v25  }
  0x3b   :  { %1701 = vset.pattern.permute.xlu1 %v1764_v2  ;;  %197 = vperm.xlu0 %1690, %v1934_v29  }
  0x3c   :  { %282 = vperm.xlu1 %1701, %v33_v24  }
  0x3f   :  { %207 = vperm.xlu0 %1690, %v1947_v33  }
  0x40   :  { %286 = vperm.xlu1 %1701, %v1842_v8  }
  0x43   :  { %217 = vperm.xlu0 %1690, %v1960_v37  }
  0x44   :  { %1702 = vset.pattern.permute.xlu1 %v1766_v5 }
  0x45   :  { %479 = vperm.xlu1 %1702, %v33_v24   ;;  %v45_v24 = vld [vmem:[%s2416_s0 + $0x90] sm:$0xff] }
  0x47   :  { %1738 = vset.pattern.permute.xlu0 %v1766_v5 }
  0x48   :  { %459 = vperm.xlu0 %1738, %v1811_v0   ;;  %v2053_v0 = vld [vmem:[%s2418_s2] ss:$0 sm:$0xff] }
  0x49   :  { %1703 = vset.pattern.permute.xlu1 %v1765_v3 }
  0x4a   :  { %102 = vperm.xlu1 %1703, %v35_v44  }
  0x4c   :  { %467 = vperm.xlu0 %1738, %v1825_v4  }
  0x4e   :  { %1704 = vset.pattern.permute.xlu1 %v1764_v2 }
  0x4f   :  { %290 = vperm.xlu1 %1704, %v35_v44  }
  0x50   :  { %475 = vperm.xlu0 %1738, %v1832_v6  }
  0x53   :  { %294 = vperm.xlu1 %1704, %v1848_v9  }
  0x54   :  { %483 = vperm.xlu0 %1738, %v1842_v8  }
  0x57   :  { %1705 = vset.pattern.permute.xlu1 %v1766_v5 }
  0x58   :  { %487 = vperm.xlu1 %1705, %v35_v44   ;;  %491 = vperm.xlu0 %1738, %v1848_v9  }
  0x5c   :  { %1706 = vset.pattern.permute.xlu1 %v1765_v3  ;;  %499 = vperm.xlu0 %1738, %v1855_v10  }
  0x5d   :  { %112 = vperm.xlu1 %1706, %v37_v48  }
  0x60   :  { %507 = vperm.xlu0 %1738, %v1862_v11  }
  0x61   :  { %1707 = vset.pattern.permute.xlu1 %v1764_v2 }
  0x62   :  { %298 = vperm.xlu1 %1707, %v37_v48  }
  0x64   :  { %515 = vperm.xlu0 %1738, %v1869_v12  }
  0x66   :  { %302 = vperm.xlu1 %1707, %v1855_v10   ;;  %v43_v10 = vld [vmem:[%s2416_s0 + $0x80] sm:$0xff] }
  0x68   :  { %523 = vperm.xlu0 %1738, %v1879_v14  }
  0x6a   :  { %1708 = vset.pattern.permute.xlu1 %v1766_v5 }
  0x6b   :  { %495 = vperm.xlu1 %1708, %v37_v48  }
  0x6c   :  { %531 = vperm.xlu0 %1738, %v1886_v15  }
  0x6f   :  { %1709 = vset.pattern.permute.xlu1 %v1765_v3 }
  0x70   :  { %122 = vperm.xlu1 %1709, %v39_v49   ;;  %539 = vperm.xlu0 %1738, %v1892_v16  }
  0x74   :  { %1710 = vset.pattern.permute.xlu1 %v1764_v2  ;;  %547 = vperm.xlu0 %1738, %v1905_v20  }
  0x75   :  { %306 = vperm.xlu1 %1710, %v39_v49  }
  0x78   :  { %555 = vperm.xlu0 %1738, %v1921_v25  }
  0x79   :  { %310 = vperm.xlu1 %1710, %v1862_v11  }
  0x7c   :  { %563 = vperm.xlu0 %1738, %v1934_v29  }
  0x7d   :  { %1711 = vset.pattern.permute.xlu1 %v1766_v5 }
  0x7e   :  { %503 = vperm.xlu1 %1711, %v39_v49  }
  0x80   :  { %571 = vperm.xlu0 %1738, %v1947_v33  }
  0x81   :  { %v2022_v51 = vpop.permute.xlu1 %67  ;;  %v259_v52 = vpop.permute.xlu0 %258 }
  0x82   :  { %1712 = vset.pattern.permute.xlu1 %v1765_v3  ;;  %v389_v55 = vmul.f32 %v2029_v53, %v259_v52  ;;  %v225_v48 = vmul.f32 %v2034_v54, %v2022_v51 }
  0x83   :  { %132 = vperm.xlu1 %1712, %v41_v50  }
  0x84   :  { %579 = vperm.xlu0 %1738, %v1960_v37  }
  0x86   :  { %v2037_v56 = vpop.permute.xlu1 %262  ;;  %v63_v57 = vpop.permute.xlu0 %62 }
  0x87   :  { %1713 = vset.pattern.permute.xlu1 %v1764_v2  ;;  %v224_v58 = vmul.f32 %v2034_v54, %v63_v57  ;;  %v390_v44 = vmul.f32 %v2029_v53, %v2037_v56 }
  0x88   :  { %314 = vperm.xlu1 %1713, %v41_v50  }
  0x89   :  { %v421_v60 = vadd.f32 %v389_v55, %v224_v58  ;;  %v422_v57 = vadd.f32 %v390_v44, %v225_v48 }
  0x8a   :  { %v2046_v61 = vpop.permute.xlu0 %77 }
  0x8b   :  { %v456_v62 = vpop.permute.xlu1 %455  ;;  %v227_v58 = vmul.f32 %v2034_v54, %v2046_v61 }
  0x8c   :  { %v586_v63 = vmul.f32 %v2044_v59, %v456_v62  ;;  %318 = vperm.xlu1 %1713, %v1869_v12  }
  0x8e   :  { %v2055_v1 = vpop.permute.xlu0 %87  ;;  %v618_v4 = vadd.f32 %v586_v63, %v421_v60 }
  0x8f   :  { %v229_v63 = vmul.f32 %v2034_v54, %v2055_v1 }
  0x90   :  { %1714 = vset.pattern.permute.xlu1 %v1766_v5  ;;  %v73_v6 = vpop.permute.xlu1 %72  ;;  %v657_v7 = vadd.f32 %v2053_v0, %v618_v4 }
  0x91   :  { %511 = vperm.xlu1 %1714, %v41_v50   ;;  %v226_v42 = vmul.f32 %v2034_v54, %v73_v6 }
  0x92   :  { %v2059_v8 = vpop.permute.xlu0 %97  ;;  %v689_v9 = vmax.f32 %v657_v7, 0.0 }
  0x94   :  { %1493 = vmatprep.mubr.f32.mxu0 %v689_v9 }
  0x95   :  { %1715 = vset.pattern.permute.xlu1 %v1765_v3  ;;  %v267_v11 = vpop.permute.xlu1 %266 }
  0x96   :  { %142 = vperm.xlu1 %1715, %v43_v10   ;;  %v2065_v12 = vpop.permute.xlu0 %107  ;;  %v391_v40 = vmul.f32 %v2029_v53, %v267_v11 }
  0x98   :  { %v423_v46 = vadd.f32 %v391_v40, %v226_v42 }
  0x99   :  { %v271_v13 = vpop.permute.xlu1 %270 }
  0x9a   :  { %1716 = vset.pattern.permute.xlu1 %v1764_v2  ;;  %v2068_v17 = vpop.permute.xlu0 %117  ;;  %v392_v56 = vmul.f32 %v2029_v53, %v271_v13 }
  0x9b   :  { %322 = vperm.xlu1 %1716, %v43_v10  }
  0x9c   :  { %v424_v11 = vadd.f32 %v392_v56, %v227_v58 }
  0x9e   :  { %v464_v18 = vpop.permute.xlu1 %463  ;;  %v2070_v19 = vpop.permute.xlu0 %127 }
  0x9f   :  { %326 = vperm.xlu1 %1716, %v1879_v14   ;;  %v588_v43 = vmul.f32 %v2044_v59, %v464_v18 }
  0xa1   :  { %v620_v49 = vadd.f32 %v588_v43, %v423_v46 }
  0xa2   :  { %v2073_v21 = vpop.permute.xlu0 %137 }
  0xa3   :  { %1717 = vset.pattern.permute.xlu1 %v1766_v5  ;;  %v83_v22 = vpop.permute.xlu1 %82 }
  0xa4   :  { %519 = vperm.xlu1 %1717, %v43_v10   ;;  %v228_v50 = vmul.f32 %v2034_v54, %v83_v22  ;;  %v659_v10 = vadd.f32 %v2053_v0, %v620_v49  ;;  %v49_v22 = vld [vmem:[%s2416_s0 + $0xb0] sm:$0xff] }
  0xa6   :  { %v2076_v23 = vpop.permute.xlu0 %147  ;;  %v691_v40 = vmax.f32 %v659_v10, 0.0 }
  0xa8   :  { %1718 = vset.pattern.permute.xlu1 %v1765_v3  ;;  %v275_v26 = vpop.permute.xlu1 %274 }
  0xa9   :  { %152 = vperm.xlu1 %1718, %v45_v24   ;;  %v393_v47 = vmul.f32 %v2029_v53, %v275_v26 }
  0xaa   :  { %v2082_v27 = vpop.permute.xlu0 %157 }
  0xab   :  { %v425_v62 = vadd.f32 %v393_v47, %v228_v50  ;;  %v233_v47 = vmul.f32 %v2034_v54, %v2065_v12 }
  0xac   :  { %v279_v28 = vpop.permute.xlu1 %278 }
  0xad   :  { %1719 = vset.pattern.permute.xlu1 %v1764_v2  ;;  %v394_v13 = vmul.f32 %v2029_v53, %v279_v28 }
  0xae   :  { %330 = vperm.xlu1 %1719, %v45_v24   ;;  %v2085_v14 = vpop.permute.xlu0 %167 }
  0xaf   :  { %v426_v43 = vadd.f32 %v394_v13, %v229_v63 }
  0xb1   :  { %v472_v30 = vpop.permute.xlu1 %471 }
  0xb2   :  { %334 = vperm.xlu1 %1719, %v1886_v15   ;;  %v2088_v31 = vpop.permute.xlu0 %177  ;;  %v590_v52 = vmul.f32 %v2044_v59, %v472_v30 }
  0xb4   :  { %v622_v6 = vadd.f32 %v590_v52, %v425_v62 }
  0xb6   :  { %1720 = vset.pattern.permute.xlu1 %v1766_v5  ;;  %v93_v32 = vpop.permute.xlu1 %92  ;;  %v2091_v34 = vpop.permute.xlu0 %187  ;;  %v661_v42 = vadd.f32 %v2053_v0, %v622_v6 }
  0xb7   :  { %527 = vperm.xlu1 %1720, %v45_v24   ;;  %v230_v7 = vmul.f32 %v2034_v54, %v93_v32 }
  0xba   :  { %v2096_v36 = vpop.permute.xlu0 %197 }
  0xbb   :  { %1721 = vset.pattern.permute.xlu1 %v1765_v3  ;;  %v283_v38 = vpop.permute.xlu1 %282 }
  0xbc   :  { %162 = vperm.xlu1 %1721, %v47_v35  }
  0xbe   :  { %v2099_v39 = vpop.permute.xlu0 %207 }
  0xbf   :  { %v287_v15 = vpop.permute.xlu1 %286 }
  0xc0   :  { %1722 = vset.pattern.permute.xlu1 %v1764_v2  ;;  %v396_v44 = vmul.f32 %v2029_v53, %v287_v15  ;;  %v693_v15 = vmax.f32 %v661_v42, 0.0 }
  0xc1   :  { %338 = vperm.xlu1 %1722, %v47_v35  }
  0xc2   :  { %v2103_v41 = vpop.permute.xlu0 %217 }
  0xc4   :  { %v480_v45 = vpop.permute.xlu1 %479 }
  0xc5   :  { %342 = vperm.xlu1 %1722, %v1892_v16   ;;  %v395_v16 = vmul.f32 %v2029_v53, %v283_v38  ;;  %v592_v61 = vmul.f32 %v2044_v59, %v480_v45 }
  0xc7   :  { %v460_v55 = vpop.permute.xlu0 %459  ;;  %v427_v24 = vadd.f32 %v395_v16, %v230_v7 }
  0xc8   :  { %v587_v60 = vmul.f32 %v2044_v59, %v460_v55 }
  0xc9   :  { %1723 = vset.pattern.permute.xlu1 %v1766_v5  ;;  %v103_v51 = vpop.permute.xlu1 %102  ;;  %v624_v38 = vadd.f32 %v592_v61, %v427_v24 }
  0xca   :  { %v619_v4 = vadd.f32 %v587_v60, %v422_v57  ;;  %535 = vperm.xlu1 %1723, %v47_v35   ;;  %v231_v35 = vmul.f32 %v2034_v54, %v2059_v8  ;;  %v232_v60 = vmul.f32 %v2034_v54, %v103_v51 }
  0xcb   :  { %v468_v9 = vpop.permute.xlu0 %467  ;;  %v663_v57 = vadd.f32 %v2053_v0, %v624_v38 }
  0xcc   :  { %v589_v18 = vmul.f32 %v2044_v59, %v468_v9  ;;  %v658_v1 = vadd.f32 %v2053_v0, %v619_v4  ;;  %v428_v58 = vadd.f32 %v396_v44, %v231_v35 }
  0xcd   :  { %v695_v61 = vmax.f32 %v663_v57, 0.0  ;;  %v53_v57 = vld [vmem:[%s2416_s0 + $0xd0] sm:$0xff] }
  0xce   :  { %v621_v26 = vadd.f32 %v589_v18, %v424_v11  ;;  %1724 = vset.pattern.permute.xlu1 %v1765_v3  ;;  %v291_v30 = vpop.permute.xlu1 %290  ;;  %v690_v32 = vmax.f32 %v658_v1, 0.0 }
  0xcf   :  { %172 = vperm.xlu1 %1724, %v49_v22   ;;  %v476_v28 = vpop.permute.xlu0 %475  ;;  %v397_v50 = vmul.f32 %v2029_v53, %v291_v30 }
  0xd0   :  { %v591_v45 = vmul.f32 %v2044_v59, %v476_v28  ;;  %1494 = vmatmul.mubr.f32.vlgmr.msra.gmra.mrb[0].mxu0 %v690_v32  ;;  %v660_v46 = vadd.f32 %v2053_v0, %v621_v26  ;;  %v235_v28 = vmul.f32 %v2034_v54, %v2068_v17 }
  0xd1   :  { %1496 = vmatprep.mubr.f32.mxu0 %v691_v40  ;;  %v429_v63 = vadd.f32 %v397_v50, %v232_v60 }
  0xd2   :  { %v623_v48 = vadd.f32 %v591_v45, %v426_v43  ;;  %v295_v8 = vpop.permute.xlu1 %294  ;;  %v692_v49 = vmax.f32 %v660_v46, 0.0 }
  0xd3   :  { %v398_v52 = vmul.f32 %v2029_v53, %v295_v8  ;;  %1725 = vset.pattern.permute.xlu1 %v1764_v2  ;;  %v484_v55 = vpop.permute.xlu0 %483 }
  0xd4   :  { %v593_v56 = vmul.f32 %v2044_v59, %v484_v55  ;;  %346 = vperm.xlu1 %1725, %v49_v22   ;;  %1497 = vmatmul.mubr.f32.gmra.mrb[2].mxu0 %v692_v49  ;;  %v662_v12 = vadd.f32 %v2053_v0, %v623_v48 }
  0xd5   :  { %1499 = vmatprep.mubr.f32.mxu0 %v693_v15  ;;  %v430_v4 = vadd.f32 %v398_v52, %v233_v47 }
  0xd6   :  { %v625_v62 = vadd.f32 %v593_v56, %v428_v58  ;;  %v694_v16 = vmax.f32 %v662_v12, 0.0  ;;  %v237_v56 = vmul.f32 %v2034_v54, %v2070_v19 }
  0xd7   :  { %v488_v6 = vpop.permute.xlu1 %487  ;;  %v492_v7 = vpop.permute.xlu0 %491 }
  0xd8   :  { %v594_v9 = vmul.f32 %v2044_v59, %v488_v6  ;;  %v595_v10 = vmul.f32 %v2044_v59, %v492_v7  ;;  %350 = vperm.xlu1 %1725, %v1905_v20   ;;  %1500 = vmatmul.mubr.f32.gmra.mrb[4].mxu0 %v694_v16  ;;  %v664_v11 = vadd.f32 %v2053_v0, %v625_v62  ;;  %v51_v20 = vld [vmem:[%s2416_s0 + $0xc0] sm:$0xff] }
  0xd9   :  { %1502 = vmatprep.mubr.f32.mxu0 %v695_v61 }
  0xda   :  { %v626_v13 = vadd.f32 %v594_v9, %v429_v63  ;;  %v627_v51 = vadd.f32 %v595_v10, %v430_v4  ;;  %v696_v18 = vmax.f32 %v664_v11, 0.0 }
  0xdb   :  { %v500_v38 = vpop.permute.xlu0 %499 }
  0xdc   :  { %1726 = vset.pattern.permute.xlu1 %v1766_v5  ;;  %v113_v1 = vpop.permute.xlu1 %112  ;;  %1503 = vmatmul.mubr.f32.gmra.mrb[6].mxu0 %v696_v18  ;;  %v665_v24 = vadd.f32 %v2053_v0, %v626_v13  ;;  %v666_v26 = vadd.f32 %v2053_v0, %v627_v51 }
  0xdd   :  { %543 = vperm.xlu1 %1726, %v49_v22   ;;  %v597_v22 = vmul.f32 %v2044_v59, %v500_v38  ;;  %v234_v45 = vmul.f32 %v2034_v54, %v113_v1  ;;  %v55_v1 = vld [vmem:[%s2416_s0 + $0xe0] sm:$0xff]  ;;  %v1003_v38 = vld [vmem:[%s2421_s5 + $0x10] sm:$0xff] }
  0xde   :  { %v697_v30 = vmax.f32 %v665_v24, 0.0  ;;  %v698_v32 = vmax.f32 %v666_v26, 0.0  ;;  %v1002_v26 = vld [vmem:[%s2421_s5 + $0x8] sm:$0xff] }
  0xe0   :  { %1505 = vmatprep.mubr.f32.mxu0 %v697_v30 }
  0xe1   :  { %1727 = vset.pattern.permute.xlu1 %v1765_v3  ;;  %v299_v35 = vpop.permute.xlu1 %298  ;;  %1506 = vmatmul.mubr.f32.gmra.mrb[8].mxu0 %v698_v32 }
  0xe2   :  { %182 = vperm.xlu1 %1727, %v51_v20   ;;  %v399_v43 = vmul.f32 %v2029_v53, %v299_v35 }
  0xe4   :  { %v431_v48 = vadd.f32 %v399_v43, %v234_v45  ;;  %v1005_v45 = vld [vmem:[%s2421_s5 + $0x20] sm:$0xff] }
  0xe5   :  { %v303_v40 = vpop.permute.xlu1 %302 }
  0xe6   :  { %v400_v42 = vmul.f32 %v2029_v53, %v303_v40  ;;  %1728 = vset.pattern.permute.xlu1 %v1764_v2 }
  0xe7   :  { %354 = vperm.xlu1 %1728, %v51_v20  }
  0xe8   :  { %v432_v44 = vadd.f32 %v400_v42, %v235_v28  ;;  %v1004_v28 = vld [vmem:[%s2421_s5 + $0x18] sm:$0xff] }
  0xea   :  { %v629_v46 = vadd.f32 %v597_v22, %v432_v44  ;;  %v496_v47 = vpop.permute.xlu1 %495  ;;  %v1657_v22 = vpack.c.bf16 %v1004_v28, %v1003_v38 }
  0xeb   :  { %v596_v8 = vmul.f32 %v2044_v59, %v496_v47  ;;  %358 = vperm.xlu1 %1728, %v1921_v25   ;;  %v508_v25 = vpop.permute.xlu0 %507 }
  0xec   :  { %v668_v49 = vadd.f32 %v2053_v0, %v629_v46  ;;  %v599_v62 = vmul.f32 %v2044_v59, %v508_v25  ;;  %v1006_v46 = vld [vmem:[%s2421_s5 + $0x28] sm:$0xff] }
  0xed   :  { %v628_v17 = vadd.f32 %v596_v8, %v431_v48  ;;  %v1661_v8 = vpack.c.bf16 %v1006_v46, %v1005_v45 }
  0xee   :  { %v700_v15 = vmax.f32 %v668_v49, 0.0 }
  0xef   :  { %1729 = vset.pattern.permute.xlu1 %v1766_v5  ;;  %v123_v50 = vpop.permute.xlu1 %122  ;;  %v667_v52 = vadd.f32 %v2053_v0, %v628_v17  ;;  %v516_v32 = vpop.permute.xlu0 %515 }
  0xf0   :  { %551 = vperm.xlu1 %1729, %v51_v20   ;;  %v236_v4 = vmul.f32 %v2034_v54, %v123_v50  ;;  %v239_v20 = vmul.f32 %v2034_v54, %v2073_v21  ;;  %v601_v42 = vmul.f32 %v2044_v59, %v516_v32 }
  0xf1   :  { %v699_v55 = vmax.f32 %v667_v52, 0.0  ;;  %v1007_v52 = vld [vmem:[%s2421_s5 + $0x30] sm:$0xff] }
  0xf3   :  { %1508 = vmatprep.mubr.f32.mxu0 %v699_v55  ;;  %v1008_v55 = vld [vmem:[%s2421_s5 + $0x38] sm:$0xff] }
  0xf4   :  { %1730 = vset.pattern.permute.xlu1 %v1765_v3  ;;  %v307_v58 = vpop.permute.xlu1 %306  ;;  %1509 = vmatmul.mubr.f32.gmra.mrb[10].mxu0 %v700_v15 }
  0xf5   :  { %192 = vperm.xlu1 %1730, %v53_v57   ;;  %v401_v16 = vmul.f32 %v2029_v53, %v307_v58 }
  0xf7   :  { %v433_v61 = vadd.f32 %v401_v16, %v236_v4  ;;  %v1011_v4 = vld [vmem:[%s2421_s5 + $0x50] sm:$0xff] }
  0xf8   :  { %v311_v12 = vpop.permute.xlu1 %310 }
  0xf9   :  { %v402_v60 = vmul.f32 %v2029_v53, %v311_v12  ;;  %1731 = vset.pattern.permute.xlu1 %v1764_v2  ;;  %v1010_v12 = vld [vmem:[%s2421_s5 + $0x48] sm:$0xff] }
  0xfa   :  { %362 = vperm.xlu1 %1731, %v53_v57  }
  0xfb   :  { %v434_v63 = vadd.f32 %v402_v60, %v237_v56  ;;  %v1009_v56 = vld [vmem:[%s2421_s5 + $0x40] sm:$0xff] }
  0xfc   :  { %v1669_v16 = vpack.c.bf16 %v1010_v12, %v1009_v56  ;;  %v245_v12 = vmul.f32 %v2034_v54, %v2085_v14 }
  0xfd   :  { %v631_v6 = vadd.f32 %v599_v62, %v434_v63  ;;  %v504_v7 = vpop.permute.xlu1 %503  ;;  %v57_v62 = vld [vmem:[%s2416_s0 + $0xf0] sm:$0xff] }
  0xfe   :  { %v598_v9 = vmul.f32 %v2044_v59, %v504_v7  ;;  %366 = vperm.xlu1 %1731, %v1934_v29   ;;  %v1001_v29 = vld [vmem:[%s2421_s5] sm:$0xff]  ;;  %v524_v7 = vpop.permute.xlu0 %523 }
  0xff   :  { %v670_v10 = vadd.f32 %v2053_v0, %v631_v6  ;;  %v1653_v30 = vpack.c.bf16 %v1002_v26, %v1001_v29  ;;  %v1012_v6 = vld [vmem:[%s2421_s5 + $0x58] sm:$0xff]  ;;  %v1015_v29 = vld [vmem:[%s2421_s5 + $0x70] sm:$0xff] }
 0x100   :  { %v630_v19 = vadd.f32 %v598_v9, %v433_v61  ;;  %v1673_v61 = vpack.c.bf16 %v1012_v6, %v1011_v4  ;;  %v241_v9 = vmul.f32 %v2034_v54, %v2076_v23  ;;  %v1016_v26 = vld [vmem:[%s2421_s5 + $0x78] sm:$0xff] }
 0x101   :  { %v702_v18 = vmax.f32 %v670_v10, 0.0  ;;  %1654 = vmatprep.subr.bf16.mxu1 %v1653_v30  ;;  %v603_v10 = vmul.f32 %v2044_v59, %v524_v7 }
 0x102   :  { %1732 = vset.pattern.permute.xlu1 %v1766_v5  ;;  %v133_v11 = vpop.permute.xlu1 %132  ;;  %v669_v13 = vadd.f32 %v2053_v0, %v630_v19  ;;  %1656 = vmatpush3.bf16.msra.mxu1 %v1653_v30 }
 0x103   :  { %559 = vperm.xlu1 %1732, %v53_v57   ;;  %1658 = vmatprep.subr.bf16.mxu1 %v1657_v22  ;;  %v238_v44 = vmul.f32 %v2034_v54, %v133_v11  ;;  %v1665_v57 = vpack.c.bf16 %v1008_v55, %v1007_v52  ;;  %v1013_v11 = vld [vmem:[%s2421_s5 + $0x60] sm:$0xff] }
 0x104   :  { %v701_v51 = vmax.f32 %v669_v13, 0.0  ;;  %v1014_v13 = vld [vmem:[%s2421_s5 + $0x68] sm:$0xff] }
 0x105   :  { %v1677_v23 = vpack.c.bf16 %v1014_v13, %v1013_v11 }
 0x106   :  { %1511 = vmatprep.mubr.f32.mxu0 %v701_v51  ;;  %1660 = vmatpush3.bf16.msra.mxu1 %v1657_v22 }
 0x107   :  { %1733 = vset.pattern.permute.xlu1 %v1765_v3  ;;  %v315_v24 = vpop.permute.xlu1 %314  ;;  %1512 = vmatmul.mubr.f32.gmra.mrb[12].mxu0 %v702_v18 }
 0x108   :  { %202 = vperm.xlu1 %1733, %v55_v1   ;;  %v403_v21 = vmul.f32 %v2029_v53, %v315_v24  ;;  %1662 = vmatprep.subr.bf16.mxu1 %v1661_v8 }
 0x10a   :  { %v435_v17 = vadd.f32 %v403_v21, %v238_v44  ;;  %1664 = vmatpush3.bf16.msra.mxu1 %v1661_v8  ;;  %v243_v44 = vmul.f32 %v2034_v54, %v2082_v27 }
 0x10b   :  { %v319_v35 = vpop.permute.xlu1 %318  ;;  %1666 = vmatprep.subr.bf16.mxu1 %v1665_v57 }
 0x10c   :  { %v404_v40 = vmul.f32 %v2029_v53, %v319_v35  ;;  %1734 = vset.pattern.permute.xlu1 %v1764_v2 }
 0x10d   :  { %370 = vperm.xlu1 %1734, %v55_v1  }
 0x10e   :  { %v436_v43 = vadd.f32 %v404_v40, %v239_v20  ;;  %1668 = vmatpush3.bf16.msra.mxu1 %v1665_v57  ;;  %v1681_v20 = vpack.c.bf16 %v1016_v26, %v1015_v29 }
 0x10f   :  { %1670 = vmatprep.subr.bf16.mxu1 %v1669_v16 }
 0x110   :  { %v633_v47 = vadd.f32 %v601_v42, %v436_v43  ;;  %v512_v48 = vpop.permute.xlu1 %511  ;;  %v532_v43 = vpop.permute.xlu0 %531 }
 0x111   :  { %v600_v49 = vmul.f32 %v2044_v59, %v512_v48  ;;  %374 = vperm.xlu1 %1734, %v1947_v33   ;;  %v605_v46 = vmul.f32 %v2044_v59, %v532_v43 }
 0x112   :  { %v672_v15 = vadd.f32 %v2053_v0, %v633_v47  ;;  %1672 = vmatpush3.bf16.msra.mxu1 %v1669_v16 }
 0x113   :  { %v632_v50 = vadd.f32 %v600_v49, %v435_v17  ;;  %1674 = vmatprep.subr.bf16.mxu1 %v1673_v61 }
 0x114   :  { %v704_v60 = vmax.f32 %v672_v15, 0.0 }
 0x115   :  { %1735 = vset.pattern.permute.xlu1 %v1766_v5  ;;  %v143_v58 = vpop.permute.xlu1 %142  ;;  %v671_v25 = vadd.f32 %v2053_v0, %v632_v50 }
 0x116   :  { %567 = vperm.xlu1 %1735, %v55_v1   ;;  %1676 = vmatpush3.bf16.msra.mxu1 %v1673_v61  ;;  %v240_v1 = vmul.f32 %v2034_v54, %v143_v58 }
 0x117   :  { %v703_v33 = vmax.f32 %v671_v25, 0.0  ;;  %1678 = vmatprep.subr.bf16.mxu1 %v1677_v23 }
 0x119   :  { %1514 = vmatprep.mubr.f32.mxu0 %v703_v33  ;;  %v540_v33 = vpop.permute.xlu0 %539 }
 0x11a   :  { %1736 = vset.pattern.permute.xlu1 %v1765_v3  ;;  %v323_v63 = vpop.permute.xlu1 %322  ;;  %1515 = vmatmul.mubr.f32.gmra.mrb[14].mxu0 %v704_v60 }
 0x11b   :  { %212 = vperm.xlu1 %1736, %v57_v62   ;;  %v405_v51 = vmul.f32 %v2029_v53, %v323_v63  ;;  %1680 = vmatpush3.bf16.msra.mxu1 %v1677_v23 }
 0x11c   :  { %1682 = vmatprep.subr.bf16.mxu1 %v1681_v20 }
 0x11d   :  { %v437_v30 = vadd.f32 %v405_v51, %v240_v1  ;;  %v548_v23 = vpop.permute.xlu0 %547  ;;  %v247_v1 = vmul.f32 %v2034_v54, %v2088_v31 }
 0x11e   :  { %v327_v19 = vpop.permute.xlu1 %326 }
 0x11f   :  { %v406_v3 = vmul.f32 %v2029_v53, %v327_v19  ;;  %1737 = vset.pattern.permute.xlu1 %v1764_v2  ;;  %1684 = vmatpush3.bf16.msra.mxu1 %v1681_v20 }
 0x120   :  { %378 = vperm.xlu1 %1737, %v57_v62  }
 0x121   :  { %v438_v18 = vadd.f32 %v406_v3, %v241_v9 }
 0x123   :  { %v635_v2 = vadd.f32 %v603_v10, %v438_v18  ;;  %v520_v24 = vpop.permute.xlu1 %519 }
 0x124   :  { %v602_v32 = vmul.f32 %v2044_v59, %v520_v24  ;;  %382 = vperm.xlu1 %1737, %v1960_v37   ;;  %v609_v24 = vmul.f32 %v2044_v59, %v548_v23  ;;  %v253_v23 = vmul.f32 %v2034_v54, %v2099_v39 }
 0x125   :  { %v674_v38 = vadd.f32 %v2053_v0, %v635_v2 }
 0x126   :  { %v634_v35 = vadd.f32 %v602_v32, %v437_v30 }
 0x127   :  { %v706_v22 = vmax.f32 %v674_v38, 0.0 }
 0x128   :  { %1739 = vset.pattern.permute.xlu1 %v1766_v5  ;;  %v153_v28 = vpop.permute.xlu1 %152  ;;  %v673_v40 = vadd.f32 %v2053_v0, %v634_v35 }
 0x129   :  { %575 = vperm.xlu1 %1739, %v57_v62   ;;  %v242_v48 = vmul.f32 %v2034_v54, %v153_v28  ;;  %v607_v62 = vmul.f32 %v2044_v59, %v540_v33 }
 0x12a   :  { %v705_v42 = vmax.f32 %v673_v40, 0.0 }
 0x12c   :  { %1517 = vmatprep.mubr.f32.mxu0 %v705_v42 }
 0x12d   :  { %v331_v21 = vpop.permute.xlu1 %330  ;;  %1518 = vmatmul.mubr.f32.gmra.mrb[16].mxu0 %v706_v22 }
 0x12e   :  { %v407_v5 = vmul.f32 %v2029_v53, %v331_v21 }
 0x130   :  { %v439_v49 = vadd.f32 %v407_v5, %v242_v48 }
 0x131   :  { %v335_v37 = vpop.permute.xlu1 %334 }
 0x132   :  { %v408_v45 = vmul.f32 %v2029_v53, %v335_v37  ;;  %v556_v37 = vpop.permute.xlu0 %555 }
 0x134   :  { %v440_v47 = vadd.f32 %v408_v45, %v243_v44  ;;  %v249_v45 = vmul.f32 %v2034_v54, %v2091_v34 }
 0x136   :  { %v637_v8 = vadd.f32 %v605_v46, %v440_v47  ;;  %v528_v17 = vpop.permute.xlu1 %527  ;;  %v611_v46 = vmul.f32 %v2044_v59, %v556_v37 }
 0x137   :  { %v604_v50 = vmul.f32 %v2044_v59, %v528_v17 }
 0x138   :  { %v676_v55 = vadd.f32 %v2053_v0, %v637_v8 }
 0x139   :  { %v636_v52 = vadd.f32 %v604_v50, %v439_v49 }
 0x13a   :  { %v708_v58 = vmax.f32 %v676_v55, 0.0 }
 0x13b   :  { %v163_v15 = vpop.permute.xlu1 %162  ;;  %v675_v27 = vadd.f32 %v2053_v0, %v636_v52 }
 0x13c   :  { %v244_v4 = vmul.f32 %v2034_v54, %v163_v15 }
 0x13d   :  { %v707_v57 = vmax.f32 %v675_v27, 0.0 }
 0x13f   :  { %1520 = vmatprep.mubr.f32.mxu0 %v707_v57 }
 0x140   :  { %v339_v25 = vpop.permute.xlu1 %338  ;;  %1521 = vmatmul.mubr.f32.gmra.mrb[18].mxu0 %v708_v58 }
 0x141   :  { %v409_v16 = vmul.f32 %v2029_v53, %v339_v25 }
 0x143   :  { %v441_v61 = vadd.f32 %v409_v16, %v244_v4 }
 0x144   :  { %v343_v56 = vpop.permute.xlu1 %342 }
 0x145   :  { %v410_v60 = vmul.f32 %v2029_v53, %v343_v56  ;;  %v251_v56 = vmul.f32 %v2034_v54, %v2096_v36 }
 0x147   :  { %v442_v63 = vadd.f32 %v410_v60, %v245_v12  ;;  %v564_v60 = vpop.permute.xlu0 %563 }
 0x148   :  { %v613_v16 = vmul.f32 %v2044_v59, %v564_v60 }
 0x149   :  { %v639_v6 = vadd.f32 %v607_v62, %v442_v63  ;;  %v536_v7 = vpop.permute.xlu1 %535 }
 0x14a   :  { %v606_v9 = vmul.f32 %v2044_v59, %v536_v7 }
 0x14b   :  { %v678_v3 = vadd.f32 %v2053_v0, %v639_v6 }
 0x14c   :  { %v638_v19 = vadd.f32 %v606_v9, %v441_v61 }
 0x14d   :  { %v710_v13 = vmax.f32 %v678_v3, 0.0 }
 0x14e   :  { %v173_v10 = vpop.permute.xlu1 %172  ;;  %v677_v14 = vadd.f32 %v2053_v0, %v638_v19 }
 0x14f   :  { %v246_v30 = vmul.f32 %v2034_v54, %v173_v10 }
 0x150   :  { %v709_v11 = vmax.f32 %v677_v14, 0.0 }
 0x152   :  { %1523 = vmatprep.mubr.f32.mxu0 %v709_v11 }
 0x153   :  { %v347_v51 = vpop.permute.xlu1 %346  ;;  %1524 = vmatmul.mubr.f32.gmra.mrb[20].mxu0 %v710_v13 }
 0x154   :  { %v411_v29 = vmul.f32 %v2029_v53, %v347_v51 }
 0x156   :  { %v443_v35 = vadd.f32 %v411_v29, %v246_v30 }
 0x157   :  { %v351_v18 = vpop.permute.xlu1 %350 }
 0x158   :  { %v412_v2 = vmul.f32 %v2029_v53, %v351_v18 }
 0x15a   :  { %v444_v26 = vadd.f32 %v412_v2, %v247_v1  ;;  %v572_v1 = vpop.permute.xlu0 %571 }
 0x15c   :  { %v641_v32 = vadd.f32 %v609_v24, %v444_v26  ;;  %v544_v20 = vpop.permute.xlu1 %543  ;;  %v615_v24 = vmul.f32 %v2044_v59, %v572_v1 }
 0x15d   :  { %v608_v38 = vmul.f32 %v2044_v59, %v544_v20 }
 0x15e   :  { %v680_v40 = vadd.f32 %v2053_v0, %v641_v32 }
 0x15f   :  { %v640_v28 = vadd.f32 %v608_v38, %v443_v35 }
 0x160   :  { %v712_v21 = vmax.f32 %v680_v40, 0.0 }
 0x161   :  { %v183_v42 = vpop.permute.xlu1 %182  ;;  %v679_v31 = vadd.f32 %v2053_v0, %v640_v28 }
 0x162   :  { %v248_v8 = vmul.f32 %v2034_v54, %v183_v42 }
 0x163   :  { %v711_v22 = vmax.f32 %v679_v31, 0.0 }
 0x165   :  { %1526 = vmatprep.mubr.f32.mxu0 %v711_v22 }
 0x166   :  { %v355_v43 = vpop.permute.xlu1 %354  ;;  %1527 = vmatmul.mubr.f32.gmra.mrb[22].mxu0 %v712_v21  ;;  %v2324_v21 = vld [vmem:[%s2420_s4] ss:$0 sm:$0xff] }
 0x167   :  { %v413_v47 = vmul.f32 %v2029_v53, %v355_v43  ;;  %v580_v43 = vpop.permute.xlu0 %579 }
 0x169   :  { %v445_v50 = vadd.f32 %v413_v47, %v248_v8 }
 0x16a   :  { %v359_v44 = vpop.permute.xlu1 %358 }
 0x16b   :  { %v414_v5 = vmul.f32 %v2029_v53, %v359_v44 }
 0x16d   :  { %v446_v48 = vadd.f32 %v414_v5, %v249_v45  ;;  %v255_v45 = vmul.f32 %v2034_v54, %v2103_v41 }
 0x16f   :  { %v643_v17 = vadd.f32 %v611_v46, %v446_v48  ;;  %v552_v49 = vpop.permute.xlu1 %551 }
 0x170   :  { %v610_v52 = vmul.f32 %v2044_v59, %v552_v49 }
 0x171   :  { %v682_v15 = vadd.f32 %v2053_v0, %v643_v17  ;;  %v617_v17 = vmul.f32 %v2044_v59, %v580_v43 }
 0x172   :  { %v642_v55 = vadd.f32 %v610_v52, %v445_v50 }
 0x173   :  { %v714_v58 = vmax.f32 %v682_v15, 0.0 }
 0x174   :  { %v193_v27 = vpop.permute.xlu1 %192  ;;  %v681_v34 = vadd.f32 %v2053_v0, %v642_v55 }
 0x175   :  { %v250_v4 = vmul.f32 %v2034_v54, %v193_v27 }
 0x176   :  { %v713_v57 = vmax.f32 %v681_v34, 0.0 }
 0x178   :  { %1529 = vmatprep.mubr.f32.mxu0 %v713_v57 }
 0x179   :  { %v363_v25 = vpop.permute.xlu1 %362  ;;  %1530 = vmatmul.mubr.f32.gmra.mrb[24].mxu0 %v714_v58 }
 0x17a   :  { %v415_v62 = vmul.f32 %v2029_v53, %v363_v25 }
 0x17c   :  { %v447_v61 = vadd.f32 %v415_v62, %v250_v4 }
 0x17d   :  { %v367_v33 = vpop.permute.xlu1 %366 }
 0x17e   :  { %v416_v12 = vmul.f32 %v2029_v53, %v367_v33 }
 0x180   :  { %v448_v63 = vadd.f32 %v416_v12, %v251_v56 }
 0x182   :  { %v645_v6 = vadd.f32 %v613_v16, %v448_v63  ;;  %v560_v7 = vpop.permute.xlu1 %559 }
 0x183   :  { %v612_v9 = vmul.f32 %v2044_v59, %v560_v7 }
 0x184   :  { %v684_v3 = vadd.f32 %v2053_v0, %v645_v6 }
 0x185   :  { %v644_v19 = vadd.f32 %v612_v9, %v447_v61 }
 0x186   :  { %v716_v11 = vmax.f32 %v684_v3, 0.0 }
 0x187   :  { %v203_v10 = vpop.permute.xlu1 %202  ;;  %v683_v36 = vadd.f32 %v2053_v0, %v644_v19 }
 0x188   :  { %v252_v26 = vmul.f32 %v2034_v54, %v203_v10 }
 0x189   :  { %v715_v14 = vmax.f32 %v683_v36, 0.0 }
 0x18b   :  { %1532 = vmatprep.mubr.f32.mxu0 %v715_v14 }
 0x18c   :  { %v371_v13 = vpop.permute.xlu1 %370  ;;  %1533 = vmatmul.mubr.f32.gmra.mrb[26].mxu0 %v716_v11 }
 0x18d   :  { %v417_v2 = vmul.f32 %v2029_v53, %v371_v13 }
 0x18f   :  { %v449_v20 = vadd.f32 %v417_v2, %v252_v26 }
 0x190   :  { %v375_v51 = vpop.permute.xlu1 %374 }
 0x191   :  { %v418_v18 = vmul.f32 %v2029_v53, %v375_v51 }
 0x193   :  { %v450_v29 = vadd.f32 %v418_v18, %v253_v23 }
 0x195   :  { %v647_v30 = vadd.f32 %v615_v24, %v450_v29  ;;  %v568_v32 = vpop.permute.xlu1 %567 }
 0x196   :  { %v614_v35 = vmul.f32 %v2044_v59, %v568_v32 }
 0x197   :  { %v686_v28 = vadd.f32 %v2053_v0, %v647_v30 }
 0x198   :  { %v646_v38 = vadd.f32 %v614_v35, %v449_v20 }
 0x199   :  { %v718_v31 = vmax.f32 %v686_v28, 0.0 }
 0x19a   :  { %v213_v40 = vpop.permute.xlu1 %212  ;;  %v685_v39 = vadd.f32 %v2053_v0, %v646_v38 }
 0x19b   :  { %v254_v50 = vmul.f32 %v2034_v54, %v213_v40 }
 0x19c   :  { %v717_v42 = vmax.f32 %v685_v39, 0.0 }
 0x19e   :  { %1535 = vmatprep.mubr.f32.mxu0 %v717_v42 }
 0x19f   :  { %v379_v22 = vpop.permute.xlu1 %378  ;;  %1536 = vmatmul.mubr.f32.gmra.mrb[28].mxu0 %v718_v31 }
 0x1a0   :  { %v419_v48 = vmul.f32 %v2029_v53, %v379_v22 }
 0x1a2   :  { %v451_v58 = vadd.f32 %v419_v48, %v254_v50 }
 0x1a3   :  { %v383_v37 = vpop.permute.xlu1 %382  ;;  %v1495_v44 = vpop.f32.mrb[0].mxu0 }
 0x1a4   :  { %v420_v46 = vmul.f32 %v2029_v53, %v383_v37  ;;  %v816_v5 = vadd.f32 %v1495_v44, %v2324_v21  ;;  %v810_v47 = vpop.f32.mrb[1].mxu0 }
 0x1a5   :  { %v811_v8 = vadd.f32 %v2324_v21, %v810_v47 }
 0x1a6   :  { %v452_v49 = vadd.f32 %v420_v46, %v255_v45  ;;  %v970_v27 = vmax.f32 %v816_v5, 0.0 }
 0x1a7   :  { %v1498_v52 = vpop.f32.mrb[2].mxu0  ;;  %v969_v55 = vmax.f32 %v811_v8, 0.0 }
 0x1a8   :  { %v649_v15 = vadd.f32 %v617_v17, %v452_v49  ;;  %v826_v41 = vadd.f32 %v1498_v52, %v2324_v21  ;;  %v576_v34 = vpop.permute.xlu1 %575  ;;  %v820_v57 = vpop.f32.mrb[3].mxu0 }
 0x1a9   :  { %v616_v25 = vmul.f32 %v2044_v59, %v576_v34  ;;  %v821_v53 = vadd.f32 %v2324_v21, %v820_v57  ;;  %1573 = vmatprep.mubr.f32.mxu1 %v969_v55 }
 0x1aa   :  { %1574 = vmatmul.mubr.f32.vlgmr.msra.gmra.mrb[0].mxu1 %v970_v27  ;;  %v972_v60 = vmax.f32 %v826_v41, 0.0  ;;  %v688_v16 = vadd.f32 %v2053_v0, %v649_v15 }
 0x1ab   :  { %v648_v33 = vadd.f32 %v616_v25, %v451_v58  ;;  %v971_v56 = vmax.f32 %v821_v53, 0.0  ;;  %v1501_v12 = vpop.f32.mrb[4].mxu0 }
 0x1ac   :  { %v836_v54 = vadd.f32 %v1501_v12, %v2324_v21  ;;  %v830_v62 = vpop.f32.mrb[5].mxu0  ;;  %v720_v3 = vmax.f32 %v688_v16, 0.0 }
 0x1ad   :  { %v831_v63 = vadd.f32 %v2324_v21, %v830_v62  ;;  %1576 = vmatprep.mubr.f32.mxu1 %v971_v56  ;;  %v687_v4 = vadd.f32 %v2053_v0, %v648_v33 }
 0x1ae   :  { %1577 = vmatmul.mubr.f32.gmra.mrb[2].mxu1 %v972_v60  ;;  %v974_v61 = vmax.f32 %v836_v54, 0.0 }
 0x1af   :  { %v973_v59 = vmax.f32 %v831_v63, 0.0  ;;  %v1504_v6 = vpop.f32.mrb[6].mxu0  ;;  %v719_v7 = vmax.f32 %v687_v4, 0.0 }
 0x1b0   :  { %v846_v9 = vadd.f32 %v1504_v6, %v2324_v21  ;;  %v840_v19 = vpop.f32.mrb[7].mxu0 }
 0x1b1   :  { %v841_v10 = vadd.f32 %v2324_v21, %v840_v19  ;;  %1538 = vmatprep.mubr.f32.mxu0 %v719_v7  ;;  %1579 = vmatprep.mubr.f32.mxu1 %v973_v59 }
 0x1b2   :  { %1539 = vmatmul.mubr.f32.gmra.mrb[30].mxu0 %v720_v3  ;;  %1580 = vmatmul.mubr.f32.gmra.mrb[4].mxu1 %v974_v61  ;;  %v976_v14 = vmax.f32 %v846_v9, 0.0 }
 0x1b3   :  { %v975_v36 = vmax.f32 %v841_v10, 0.0 }
 0x1b4   :  { %v1507_v11 = vpop.f32.mrb[8].mxu0 }
 0x1b5   :  { %v856_v0 = vadd.f32 %v1507_v11, %v2324_v21  ;;  %v850_v13 = vpop.f32.mrb[9].mxu0  ;;  %1582 = vmatprep.mubr.f32.mxu1 %v975_v36 }
 0x1b6   :  { %v851_v51 = vadd.f32 %v2324_v21, %v850_v13  ;;  %1583 = vmatmul.mubr.f32.gmra.mrb[6].mxu1 %v976_v14 }
 0x1b7   :  { %v978_v18 = vmax.f32 %v856_v0, 0.0 }
 0x1b8   :  { %v977_v23 = vmax.f32 %v851_v51, 0.0  ;;  %v2368_v51 = vld [vmem:[%s2422_s6] ss:$0 sm:$0xff]  ;;  %s1767_s6 = smov [#allocation2]  }
 0x1b9   :  { %s1351_s16 = sshll.u32 %s1767_s6, 4  ;;  %s1352_s16 = int_to_ptr.vmem [resolvable:$true] %s1351_s16 }
 0x1ba   :  { %1585 = vmatprep.mubr.f32.mxu1 %v977_v23  ;;  %s1740_s17 = scalar_lea.vmem %s1352_s16, 128  ;;  %p1745_p1 = scmp.lt.s32.totalorder %s1352_s16, %s1352_s16 }
 0x1bb   :  { %1586 = vmatmul.mubr.f32.gmra.mrb[8].mxu1 %v978_v18  ;;  %p1741_p0 = scmp.ne.s32.totalorder %s1352_s16, %s1740_s17  ;;  %p1746_p2 = scmp.lt.s32.totalorder %s1740_s17, %s1740_s17 }
 0x1bd   :  { %p1747_p3 = por %p1746_p2, %p1745_p1 }
 0x1bf   :  { %p1748_p4 = pnand %p1747_p3, %p1741_p0 }
 0x1c7   :  { %v1510_v1 = vpop.f32.mrb[10].mxu0 }
 0x1c8   :  { %v866_v2 = vadd.f32 %v1510_v1, %v2324_v21  ;;  %v860_v24 = vpop.f32.mrb[11].mxu0 }
 0x1c9   :  { %v861_v29 = vadd.f32 %v2324_v21, %v860_v24 }
 0x1ca   :  { %v980_v30 = vmax.f32 %v866_v2, 0.0 }
 0x1cb   :  { %v979_v26 = vmax.f32 %v861_v29, 0.0 }
 0x1cd   :  { %1588 = vmatprep.mubr.f32.mxu1 %v979_v26 }
 0x1ce   :  { %1589 = vmatmul.mubr.f32.gmra.mrb[10].mxu1 %v980_v30 }
 0x1da   :  { %v1513_v32 = vpop.f32.mrb[12].mxu0 }
 0x1db   :  { %v876_v20 = vadd.f32 %v1513_v32, %v2324_v21  ;;  %v870_v35 = vpop.f32.mrb[13].mxu0 }
 0x1dc   :  { %v871_v38 = vadd.f32 %v2324_v21, %v870_v35 }
 0x1dd   :  { %v982_v40 = vmax.f32 %v876_v20, 0.0 }
 0x1de   :  { %v981_v28 = vmax.f32 %v871_v38, 0.0 }
 0x1e0   :  { %1591 = vmatprep.mubr.f32.mxu1 %v981_v28 }
 0x1e1   :  { %1592 = vmatmul.mubr.f32.gmra.mrb[12].mxu1 %v982_v40 }
 0x1ed   :  { %v1516_v39 = vpop.f32.mrb[14].mxu0 }
 0x1ee   :  { %v886_v42 = vadd.f32 %v1516_v39, %v2324_v21  ;;  %v880_v31 = vpop.f32.mrb[15].mxu0 }
 0x1ef   :  { %v881_v22 = vadd.f32 %v2324_v21, %v880_v31 }
 0x1f0   :  { %v984_v37 = vmax.f32 %v886_v42, 0.0 }
 0x1f1   :  { %v983_v43 = vmax.f32 %v881_v22, 0.0 }
 0x1f3   :  { %1594 = vmatprep.mubr.f32.mxu1 %v983_v43 }
 0x1f4   :  { %1595 = vmatmul.mubr.f32.gmra.mrb[14].mxu1 %v984_v37 }
 0x200   :  { %v1519_v44 = vpop.f32.mrb[16].mxu0 }
 0x201   :  { %v896_v45 = vadd.f32 %v1519_v44, %v2324_v21  ;;  %v890_v46 = vpop.f32.mrb[17].mxu0 }
 0x202   :  { %v891_v5 = vadd.f32 %v2324_v21, %v890_v46 }
 0x203   :  { %v986_v48 = vmax.f32 %v896_v45, 0.0 }
 0x204   :  { %v985_v47 = vmax.f32 %v891_v5, 0.0 }
 0x206   :  { %1597 = vmatprep.mubr.f32.mxu1 %v985_v47 }
 0x207   :  { %1598 = vmatmul.mubr.f32.gmra.mrb[16].mxu1 %v986_v48 }
 0x213   :  { %v1522_v8 = vpop.f32.mrb[18].mxu0 }
 0x214   :  { %v906_v17 = vadd.f32 %v1522_v8, %v2324_v21  ;;  %v900_v49 = vpop.f32.mrb[19].mxu0 }
 0x215   :  { %v901_v50 = vadd.f32 %v2324_v21, %v900_v49 }
 0x216   :  { %v988_v55 = vmax.f32 %v906_v17, 0.0 }
 0x217   :  { %v987_v52 = vmax.f32 %v901_v50, 0.0 }
 0x219   :  { %1600 = vmatprep.mubr.f32.mxu1 %v987_v52 }
 0x21a   :  { %1601 = vmatmul.mubr.f32.gmra.mrb[18].mxu1 %v988_v55 }
 0x226   :  { %v1525_v15 = vpop.f32.mrb[20].mxu0 }
 0x227   :  { %v916_v27 = vadd.f32 %v1525_v15, %v2324_v21  ;;  %v910_v41 = vpop.f32.mrb[21].mxu0 }
 0x228   :  { %v911_v34 = vadd.f32 %v2324_v21, %v910_v41 }
 0x229   :  { %v990_v58 = vmax.f32 %v916_v27, 0.0 }
 0x22a   :  { %v989_v57 = vmax.f32 %v911_v34, 0.0 }
 0x22c   :  { %1603 = vmatprep.mubr.f32.mxu1 %v989_v57 }
 0x22d   :  { %1604 = vmatmul.mubr.f32.gmra.mrb[20].mxu1 %v990_v58 }
 0x239   :  { %v1528_v25 = vpop.f32.mrb[22].mxu0 }
 0x23a   :  { %v926_v53 = vadd.f32 %v1528_v25, %v2324_v21  ;;  %v920_v33 = vpop.f32.mrb[23].mxu0 }
 0x23b   :  { %v921_v56 = vadd.f32 %v2324_v21, %v920_v33 }
 0x23c   :  { %v992_v60 = vmax.f32 %v926_v53, 0.0 }
 0x23d   :  { %v991_v12 = vmax.f32 %v921_v56, 0.0 }
 0x23f   :  { %1606 = vmatprep.mubr.f32.mxu1 %v991_v12 }
 0x240   :  { %1607 = vmatmul.mubr.f32.gmra.mrb[22].mxu1 %v992_v60 }
 0x24c   :  { %v1531_v54 = vpop.f32.mrb[24].mxu0 }
 0x24d   :  { %v936_v62 = vadd.f32 %v1531_v54, %v2324_v21  ;;  %v930_v16 = vpop.f32.mrb[25].mxu0 }
 0x24e   :  { %v931_v63 = vadd.f32 %v2324_v21, %v930_v16 }
 0x24f   :  { %v994_v59 = vmax.f32 %v936_v62, 0.0 }
 0x250   :  { %v993_v4 = vmax.f32 %v931_v63, 0.0 }
 0x252   :  { %1609 = vmatprep.mubr.f32.mxu1 %v993_v4 }
 0x253   :  { %1610 = vmatmul.mubr.f32.gmra.mrb[24].mxu1 %v994_v59 }
 0x25f   :  { %v1534_v6 = vpop.f32.mrb[26].mxu0 }
 0x260   :  { %v946_v7 = vadd.f32 %v1534_v6, %v2324_v21  ;;  %v940_v61 = vpop.f32.mrb[27].mxu0 }
 0x261   :  { %v941_v9 = vadd.f32 %v2324_v21, %v940_v61 }
 0x262   :  { %v996_v3 = vmax.f32 %v946_v7, 0.0 }
 0x263   :  { %v995_v19 = vmax.f32 %v941_v9, 0.0 }
 0x265   :  { %1612 = vmatprep.mubr.f32.mxu1 %v995_v19 }
 0x266   :  { %1613 = vmatmul.mubr.f32.gmra.mrb[26].mxu1 %v996_v3 }
 0x272   :  { %v1537_v10 = vpop.f32.mrb[28].mxu0 }
 0x273   :  { %v956_v36 = vadd.f32 %v1537_v10, %v2324_v21  ;;  %v950_v14 = vpop.f32.mrb[29].mxu0 }
 0x274   :  { %v951_v11 = vadd.f32 %v2324_v21, %v950_v14 }
 0x275   :  { %v998_v13 = vmax.f32 %v956_v36, 0.0 }
 0x276   :  { %v997_v0 = vmax.f32 %v951_v11, 0.0 }
 0x278   :  { %1615 = vmatprep.mubr.f32.mxu1 %v997_v0 }
 0x279   :  { %1616 = vmatmul.mubr.f32.gmra.mrb[28].mxu1 %v998_v13 }
 0x27d   :  { %v1575_v23 = vpop.f32.mrb[0].mxu1 }
 0x27e   :  { %v1096_v18 = vadd.f32 %v1575_v23, %v2368_v51  ;;  %v1090_v1 = vpop.f32.mrb[1].mxu1 }
 0x27f   :  { %v1091_v2 = vadd.f32 %v2368_v51, %v1090_v1 }
 0x281   :  { %v1249_v24 = vmax.f32 %v1091_v2, %v1096_v18  ;;  %v1578_v29 = vpop.f32.mrb[2].mxu1 }
 0x282   :  { %v1100_v26 = vpop.f32.mrb[3].mxu1  ;;  %v1106_v32 = vadd.f32 %v1578_v29, %v2368_v51 }
 0x283   :  { %v1101_v30 = vadd.f32 %v2368_v51, %v1100_v26 }
 0x285   :  { %v1250_v20 = vmax.f32 %v1249_v24, %v1101_v30  ;;  %v1540_v35 = vpop.f32.mrb[30].mxu0  ;;  %v1581_v38 = vpop.f32.mrb[4].mxu1 }
 0x286   :  { %v966_v28 = vadd.f32 %v1540_v35, %v2324_v21  ;;  %v1116_v40 = vadd.f32 %v1581_v38, %v2368_v51  ;;  %v960_v39 = vpop.f32.mrb[31].mxu0  ;;  %v1110_v42 = vpop.f32.mrb[5].mxu1 }
 0x287   :  { %v1251_v31 = vmax.f32 %v1250_v20, %v1106_v32  ;;  %v961_v22 = vadd.f32 %v2324_v21, %v960_v39  ;;  %v1111_v43 = vadd.f32 %v2368_v51, %v1110_v42 }
 0x288   :  { %v1000_v5 = vmax.f32 %v966_v28, 0.0 }
 0x289   :  { %v1252_v37 = vrot.slane %v1251_v31, 4  ;;  %v999_v44 = vmax.f32 %v961_v22, 0.0  ;;  %v1258_v45 = vmax.f32 %v1111_v43, %v1116_v40  ;;  %v1584_v46 = vpop.f32.mrb[6].mxu1 }
 0x28a   :  { %v1120_v47 = vpop.f32.mrb[7].mxu1  ;;  %v1126_v17 = vadd.f32 %v1584_v46, %v2368_v51 }
 0x28b   :  { %v1253_v48 = vmax.f32 %v1251_v31, %v1252_v37  ;;  %v1121_v8 = vadd.f32 %v2368_v51, %v1120_v47  ;;  %1618 = vmatprep.mubr.f32.mxu1 %v999_v44 }
 0x28c   :  { %1619 = vmatmul.mubr.f32.gmra.mrb[30].mxu1 %v1000_v5 }
 0x28d   :  { %v1259_v49 = vmax.f32 %v1258_v45, %v1121_v8  ;;  %v1254_v52 = vrot.slane %v1253_v48, 2 }
 0x28e   :  { %v1587_v50 = vpop.f32.mrb[8].mxu1 }
 0x28f   :  { %v1260_v55 = vmax.f32 %v1259_v49, %v1126_v17  ;;  %v1136_v21 = vadd.f32 %v1587_v50, %v2368_v51  ;;  %v1130_v15 = vpop.f32.mrb[9].mxu1  ;;  %v1255_v57 = vmax.f32 %v1253_v48, %v1254_v52 }
 0x290   :  { %v1131_v27 = vadd.f32 %v2368_v51, %v1130_v15 }
 0x291   :  { %v1261_v41 = vrot.slane %v1260_v55, 4  ;;  %v1256_v53 = vrot.slane %v1255_v57, 1 }
 0x292   :  { %v1267_v34 = vmax.f32 %v1131_v27, %v1136_v21 }
 0x293   :  { %v1262_v58 = vmax.f32 %v1260_v55, %v1261_v41  ;;  %v1257_v12 = vmax.f32 %v1255_v57, %v1256_v53 }
 0x295   :  { %v1263_v25 = vrot.slane %v1262_v58, 2 }
 0x297   :  { %v1264_v33 = vmax.f32 %v1262_v58, %v1263_v25 }
 0x299   :  { %v1265_v56 = vrot.slane %v1264_v33, 1 }
 0x29b   :  { %v1266_v60 = vmax.f32 %v1264_v33, %v1265_v56 }
 0x29d   :  { %v1330_v54 = vsel %vm1329_vm0, %v1266_v60, %v1257_v12 }
 0x2a1   :  { %v1590_v62 = vpop.f32.mrb[10].mxu1 }
 0x2a2   :  { %v1140_v16 = vpop.f32.mrb[11].mxu1  ;;  %v1146_v4 = vadd.f32 %v1590_v62, %v2368_v51 }
 0x2a3   :  { %v1141_v63 = vadd.f32 %v2368_v51, %v1140_v16 }
 0x2a5   :  { %v1268_v59 = vmax.f32 %v1267_v34, %v1141_v63 }
 0x2a7   :  { %v1269_v6 = vmax.f32 %v1268_v59, %v1146_v4 }
 0x2a9   :  { %v1270_v7 = vrot.slane %v1269_v6, 4 }
 0x2ab   :  { %v1271_v61 = vmax.f32 %v1269_v6, %v1270_v7 }
 0x2ad   :  { %v1272_v9 = vrot.slane %v1271_v61, 2 }
 0x2af   :  { %v1273_v19 = vmax.f32 %v1271_v61, %v1272_v9 }
 0x2b1   :  { %v1274_v3 = vrot.slane %v1273_v19, 1 }
 0x2b3   :  { %v1275_v10 = vmax.f32 %v1273_v19, %v1274_v3 }
 0x2b4   :  { %v1593_v36 = vpop.f32.mrb[12].mxu1 }
 0x2b5   :  { %v1156_v14 = vadd.f32 %v1593_v36, %v2368_v51  ;;  %v1150_v11 = vpop.f32.mrb[13].mxu1  ;;  %v1332_v0 = vsel %vm1331_vm1, %v1275_v10, %v1330_v54 }
 0x2b6   :  { %v1151_v13 = vadd.f32 %v2368_v51, %v1150_v11 }
 0x2b8   :  { %v1276_v23 = vmax.f32 %v1151_v13, %v1156_v14 }
 0x2c7   :  { %v1596_v18 = vpop.f32.mrb[14].mxu1 }
 0x2c8   :  { %v1160_v1 = vpop.f32.mrb[15].mxu1  ;;  %v1166_v24 = vadd.f32 %v1596_v18, %v2368_v51 }
 0x2c9   :  { %v1161_v2 = vadd.f32 %v2368_v51, %v1160_v1 }
 0x2cb   :  { %v1277_v29 = vmax.f32 %v1276_v23, %v1161_v2 }
 0x2cd   :  { %v1278_v26 = vmax.f32 %v1277_v29, %v1166_v24 }
 0x2cf   :  { %v1279_v30 = vrot.slane %v1278_v26, 4 }
 0x2d1   :  { %v1280_v32 = vmax.f32 %v1278_v26, %v1279_v30 }
 0x2d3   :  { %v1281_v20 = vrot.slane %v1280_v32, 2 }
 0x2d5   :  { %v1282_v35 = vmax.f32 %v1280_v32, %v1281_v20 }
 0x2d7   :  { %v1283_v38 = vrot.slane %v1282_v35, 1 }
 0x2d9   :  { %v1284_v28 = vmax.f32 %v1282_v35, %v1283_v38 }
 0x2da   :  { %v1599_v40 = vpop.f32.mrb[16].mxu1 }
 0x2db   :  { %v1176_v39 = vadd.f32 %v1599_v40, %v2368_v51  ;;  %v1170_v42 = vpop.f32.mrb[17].mxu1  ;;  %v1334_v31 = vsel %vm1333_vm2, %v1284_v28, %v1332_v0 }
 0x2dc   :  { %v1171_v22 = vadd.f32 %v2368_v51, %v1170_v42 }
 0x2de   :  { %v1285_v43 = vmax.f32 %v1171_v22, %v1176_v39 }
 0x2ed   :  { %v1602_v37 = vpop.f32.mrb[18].mxu1 }
 0x2ee   :  { %v1180_v44 = vpop.f32.mrb[19].mxu1  ;;  %v1186_v46 = vadd.f32 %v1602_v37, %v2368_v51 }
 0x2ef   :  { %v1181_v45 = vadd.f32 %v2368_v51, %v1180_v44 }
 0x2f1   :  { %v1286_v5 = vmax.f32 %v1285_v43, %v1181_v45 }
 0x2f3   :  { %v1287_v47 = vmax.f32 %v1286_v5, %v1186_v46 }
 0x2f5   :  { %v1288_v48 = vrot.slane %v1287_v47, 4 }
 0x2f7   :  { %v1289_v8 = vmax.f32 %v1287_v47, %v1288_v48 }
 0x2f9   :  { %v1290_v17 = vrot.slane %v1289_v8, 2 }
 0x2fb   :  { %v1291_v49 = vmax.f32 %v1289_v8, %v1290_v17 }
 0x2fd   :  { %v1292_v50 = vrot.slane %v1291_v49, 1 }
 0x2ff   :  { %v1293_v52 = vmax.f32 %v1291_v49, %v1292_v50 }
 0x300   :  { %v1605_v55 = vpop.f32.mrb[20].mxu1 }
 0x301   :  { %v1196_v21 = vadd.f32 %v1605_v55, %v2368_v51  ;;  %v1190_v15 = vpop.f32.mrb[21].mxu1  ;;  %v1336_v27 = vsel %vm1335_vm3, %v1293_v52, %v1334_v31 }
 0x302   :  { %v1191_v41 = vadd.f32 %v2368_v51, %v1190_v15 }
 0x304   :  { %v1294_v34 = vmax.f32 %v1191_v41, %v1196_v21 }
 0x313   :  { %v1608_v57 = vpop.f32.mrb[22].mxu1 }
 0x314   :  { %v1200_v58 = vpop.f32.mrb[23].mxu1  ;;  %v1206_v53 = vadd.f32 %v1608_v57, %v2368_v51 }
 0x315   :  { %v1201_v25 = vadd.f32 %v2368_v51, %v1200_v58 }
 0x317   :  { %v1295_v33 = vmax.f32 %v1294_v34, %v1201_v25 }
 0x319   :  { %v1296_v56 = vmax.f32 %v1295_v33, %v1206_v53 }
 0x31b   :  { %v1297_v12 = vrot.slane %v1296_v56, 4 }
 0x31d   :  { %v1298_v60 = vmax.f32 %v1296_v56, %v1297_v12 }
 0x31f   :  { %v1299_v54 = vrot.slane %v1298_v60, 2 }
 0x321   :  { %v1300_v62 = vmax.f32 %v1298_v60, %v1299_v54 }
 0x323   :  { %v1301_v16 = vrot.slane %v1300_v62, 1 }
 0x325   :  { %v1302_v63 = vmax.f32 %v1300_v62, %v1301_v16 }
 0x326   :  { %v1611_v4 = vpop.f32.mrb[24].mxu1 }
 0x327   :  { %v1216_v59 = vadd.f32 %v1611_v4, %v2368_v51  ;;  %v1210_v6 = vpop.f32.mrb[25].mxu1  ;;  %v1338_v7 = vsel %vm1337_vm4, %v1302_v63, %v1336_v27 }
 0x328   :  { %v1211_v61 = vadd.f32 %v2368_v51, %v1210_v6 }
 0x32a   :  { %v1303_v9 = vmax.f32 %v1211_v61, %v1216_v59 }
 0x339   :  { %v1614_v19 = vpop.f32.mrb[26].mxu1 }
 0x33a   :  { %v1220_v3 = vpop.f32.mrb[27].mxu1  ;;  %v1226_v36 = vadd.f32 %v1614_v19, %v2368_v51 }
 0x33b   :  { %v1221_v10 = vadd.f32 %v2368_v51, %v1220_v3 }
 0x33d   :  { %v1304_v14 = vmax.f32 %v1303_v9, %v1221_v10 }
 0x33f   :  { %v1305_v11 = vmax.f32 %v1304_v14, %v1226_v36 }
 0x341   :  { %v1306_v0 = vrot.slane %v1305_v11, 4 }
 0x343   :  { %v1307_v13 = vmax.f32 %v1305_v11, %v1306_v0 }
 0x345   :  { %v1308_v23 = vrot.slane %v1307_v13, 2 }
 0x347   :  { %v1309_v18 = vmax.f32 %v1307_v13, %v1308_v23 }
 0x349   :  { %v1310_v1 = vrot.slane %v1309_v18, 1 }
 0x34b   :  { %v1311_v2 = vmax.f32 %v1309_v18, %v1310_v1 }
 0x34c   :  { %v1617_v24 = vpop.f32.mrb[28].mxu1 }
 0x34d   :  { %v1236_v29 = vadd.f32 %v1617_v24, %v2368_v51  ;;  %v1230_v26 = vpop.f32.mrb[29].mxu1  ;;  %v1340_v30 = vsel %vm1339_vm5, %v1311_v2, %v1338_v7 }
 0x34e   :  { %v1231_v32 = vadd.f32 %v2368_v51, %v1230_v26 }
 0x350   :  { %v1312_v20 = vmax.f32 %v1231_v32, %v1236_v29 }
 0x35f   :  { %v1620_v35 = vpop.f32.mrb[30].mxu1 }
 0x360   :  { %v1240_v38 = vpop.f32.mrb[31].mxu1  ;;  %v1246_v40 = vadd.f32 %v1620_v35, %v2368_v51 }
 0x361   :  { %v1241_v28 = vadd.f32 %v2368_v51, %v1240_v38 }
 0x363   :  { %v1313_v39 = vmax.f32 %v1312_v20, %v1241_v28 }
 0x365   :  { %v1314_v42 = vmax.f32 %v1313_v39, %v1246_v40 }
 0x367   :  { %v1315_v31 = vrot.slane %v1314_v42, 4 }
 0x369   :  { %v1316_v22 = vmax.f32 %v1314_v42, %v1315_v31 }
 0x36b   :  { %v1317_v43 = vrot.slane %v1316_v22, 2 }
 0x36d   :  { %v1318_v37 = vmax.f32 %v1316_v22, %v1317_v43 }
 0x36f   :  { %v1319_v44 = vrot.slane %v1318_v37, 1 }
 0x371   :  { %v1320_v45 = vmax.f32 %v1318_v37, %v1319_v44 }
 0x373   :  { %v1342_v46 = vsel %vm1341_vm6, %v1320_v45, %v1340_v30 }
 0x374   :  { %1344 = vst [vmem:[#allocation2] sm:$0xff] %v1342_v46 }
 0x375   :  { %1751 = shalt.err (!%p1748_p4)
}
 0x376   :  { %s1752_s19 = scalar_lea.hbm %s2423_s7, 128 }
 0x377   :  { %p1753_p5 = scmp.ne.s32.totalorder %s2423_s7, %s1752_s19  ;;  %p1756_p6 = scmp.lt.u32.totalorder %s1752_s19, %s2423_s7 }
 0x379   :  { %p1758_p7 = pnand %p1756_p6, %p1753_p5 }
 0x37b   :  { %1761 = shalt.err (!%p1758_p7)
}
 0x37c   :  { %1354 = dma.vmem_to_hbm [thread:$0]  %s1352_s16, 128, %s2423_s7, [#allocation3]  }
 0x37d   :  { %1762 = dma.done.wait [#allocation3], 128  }
 0x37e   :  { %1763 = vsyncadd [#allocation3], 4294967168 }
 0x37f   :  { %1358 = vsyncpa [#allocation3], 1 }

</bundles_post_ra>
